<compile_context>
chip_gen: v7x
topology: tpu7x:2x2x1
jax: 0.10.0
libtpu: 0.0.40
codegen_flags: <defaults>
</compile_context>

<pallas_src>
import numpy as np
import jax
import jax.numpy as jnp
from jax.experimental import pallas as pl
from jax.experimental.pallas import tpu as pltpu

# ---------------- static configuration (synthetic, deterministic) -------------
NUM_CLASSES = 8
SUB_COUNTS = (40, 30, 16, 12, 10, 10, 8, 4)          # per-class num_subclasses, sums to 130
TOTAL_SUBCLASSES = sum(SUB_COUNTS)                   # 130 (matches hard-coded output width)
OFFSETS = tuple(int(v) for v in np.cumsum((0,) + SUB_COUNTS)[:NUM_CLASSES])
HID_SIZES = tuple(2 * s for s in SUB_COUNTS)         # TentacleNet hidden widths, sum = 260
SUM_HID = sum(HID_SIZES)                             # 260
NUM_HIDDEN = 2                                       # hidden layers per TentacleNet
SKIP = 1.0                                           # TentacleNet skip connection enabled
CLASS_HIDDEN = 2 * NUM_CLASSES                       # 16
OUT_PAD = 256                                        # lane-dense padded output width

NUM_GENES = 64                                       # columns of the expression matrix x
GENE_SET_SIZES = {"class": 24, "rgc": 32, "ac": 30, "bc": 28, "hc": 20, "nn": 22}
# class_id -> which gene set it reads (mirrors the original: 2,3,4 share BC, 7 uses class genes)
CLASS_GENE_SET = ("rgc", "ac", "bc", "bc", "bc", "hc", "nn", "class")

# Hidden-lane regrouping: classes {0,2,6} (80+32+16 = 128 lanes) fill the first,
# lane-aligned 128-wide block; the remaining classes (132 lanes) fill the second.
CLASS_LANE_ORDER = (0, 2, 6, 1, 3, 4, 5, 7)
HID_A = 128
HID_B = SUM_HID - HID_A                              # 132
_off, _acc = {}, 0
for _c in CLASS_LANE_ORDER:
    _off[_c] = _acc
    _acc += HID_SIZES[_c]
HID_LANE_OFFSETS = tuple(_off[c] for c in range(NUM_CLASSES))
assert HID_SIZES[0] + HID_SIZES[2] + HID_SIZES[6] == HID_A
assert _acc == SUM_HID


# ------------------------------- kernel ---------------------------------------
def _cuttlenet_kernel(x_ref, wg_ref, bg_ref, cw1_ref, cb1_ref, cw2_ref, cb2_ref,
                      w1c_ref, whA_ref, bhA_ref, whB_ref, bhB_ref,
                      w2a_ref, w2b_ref, b2_ref, et_ref, e2_ref, out_ref):
    f32 = jnp.float32
    cd = wg_ref.dtype                                # bf16 (prod) or f32 (exactness check)
    x = x_ref[...]                                   # [B, NUM_GENES] f32
    xb = x.astype(cd)

    # ---- fused TentacleNet fc1 (all 8 gene blocks, gene gather folded into rows) ----
    g = jnp.dot(xb, wg_ref[...], preferred_element_type=f32) + bg_ref[...]       # [B, 260]

    # ---- class-level net (tiny; kept f32): relu(fc1) -> log_softmax(fc2) ----
    h_cls = jnp.maximum(
        jnp.dot(x, cw1_ref[...], preferred_element_type=f32) + cb1_ref[...], 0.0)  # [B, 16]
    cl = jnp.dot(h_cls, cw2_ref[...], preferred_element_type=f32) + cb2_ref[...]   # [B, 8]
    m = jnp.max(cl, axis=-1, keepdims=True)
    s = cl - m
    class_out = s - jnp.log(jnp.sum(jnp.exp(s), axis=-1, keepdims=True))           # [B, 8]

    # ---- class_out contribution to every fc1, then ReLU ----
    a = jnp.maximum(g + jnp.dot(class_out, w1c_ref[...], preferred_element_type=f32), 0.0)
    a1 = a[:, :HID_A]                                # lane-aligned split at 128
    a2 = a[:, HID_A:]                                # [B, 132]
    s1 = a1 * SKIP
    s2 = a2 * SKIP

    # ---- block-diagonal hidden layers as two tile-aligned dots per layer ----
    for l in range(NUM_HIDDEN):
        a1 = jnp.maximum(jnp.dot(a1.astype(cd), whA_ref[l],
                                 preferred_element_type=f32) + bhA_ref[l], 0.0)
        a2 = jnp.maximum(jnp.dot(a2.astype(cd), whB_ref[l],
                                 preferred_element_type=f32) + bhB_ref[l], 0.0)
    a1 = a1 + s1
    a2 = a2 + s2

    # ---- all fc2s as two block dots, padded to OUT_PAD lanes ----
    z = (jnp.dot(a1.astype(cd), w2a_ref[...], preferred_element_type=f32)
         + jnp.dot(a2.astype(cd), w2b_ref[...], preferred_element_type=f32)
         + b2_ref[...])                                                           # [B, 256]

    # ---- segment-wise log-softmax, full-width ----
    # One global row max as the stability constant, one full-width exp (EUP),
    # per-segment denominators via a single MXU reduction against e^T.
    M = jnp.max(z, axis=-1, keepdims=True)                                        # [B, 1]
    p = jnp.exp(z - M)                                                            # [B, 256]
    seg_sum = jnp.dot(p, et_ref[...], preferred_element_type=f32)                 # [B, 8]
    lse = M + jnp.log(seg_sum)                                                    # [B, 8]

    # Expand per-class scale (class_out) and per-segment lse to full width with
    # ONE [B,16]@[16,512] dot against the block-stacked 0/1 matrix, then one
    # lane-dense multiply + one full-width store.
    r = jnp.dot(jnp.concatenate([class_out, lse], axis=1), e2_ref[...],
                preferred_element_type=f32)                                       # [B, 512]
    scale = r[:, :OUT_PAD]
    lse_full = r[:, OUT_PAD:]
    out_ref[...] = ((z - lse_full) * scale).astype(out_ref.dtype)


# --------------------------- host-side parameter packing -----------------------
def pack_inputs(params, gene_indices, compute_dtype=jnp.bfloat16):
    """Pack all weights into a handful of dense arrays (one-time host work).

    Matmul weights on the big dots are stored in `compute_dtype` (bf16 by
    default, f32 accumulation in-kernel); biases / class net / 0-1 expansion
    matrices stay f32.
    """
    wg = np.zeros((NUM_GENES, SUM_HID), np.float32)      # scattered fused fc1 weight
    bg = np.zeros((1, SUM_HID), np.float32)
    cw1 = np.zeros((NUM_GENES, CLASS_HIDDEN), np.float32)  # scattered class fc1
    cb1 = np.asarray(params["class_fc1_b"], np.float32)
    cw2 = np.asarray(params["class_fc2_w"], np.float32)
    cb2 = np.asarray(params["class_fc2_b"], np.float32)
    w1c = np.zeros((NUM_CLASSES, SUM_HID), np.float32)
    whA = np.zeros((NUM_HIDDEN, HID_A, HID_A), np.float32)   # block-diag, lanes 0:128
    bhA = np.zeros((NUM_HIDDEN, 1, HID_A), np.float32)
    whB = np.zeros((NUM_HIDDEN, HID_B, HID_B), np.float32)   # block-diag, lanes 128:260
    bhB = np.zeros((NUM_HIDDEN, 1, HID_B), np.float32)
    w2a = np.zeros((HID_A, OUT_PAD), np.float32)
    w2b = np.zeros((HID_B, OUT_PAD), np.float32)
    b2 = np.zeros((1, OUT_PAD), np.float32)
    e = np.zeros((NUM_CLASSES, OUT_PAD), np.float32)         # segment expansion matrix

    cls_idx = np.asarray(gene_indices["class_net"])
    cw1[cls_idx, :] = np.asarray(params["class_fc1_w"])      # class gene gather folded in

    for c in range(NUM_CLASSES):
        plist = params["subclass"][c]
        w1g_c, w1c_c, b1_c = plist[0], plist[1], plist[2]
        hidden = plist[3:3 + 2 * NUM_HIDDEN]
        w2_c, b2_c = plist[-2], plist[-1]
        idx = np.asarray(gene_indices[c])
        ho, hs = HID_LANE_OFFSETS[c], HID_SIZES[c]
        so, ss = OFFSETS[c], SUB_COUNTS[c]

        wg[idx, ho:ho + hs] = np.asarray(w1g_c)              # gene rows scattered
        bg[0, ho:ho + hs] = np.asarray(b1_c)[0]
        w1c[:, ho:ho + hs] = np.asarray(w1c_c)               # class_out -> fc1 part
        if ho < HID_A:                                       # first (128-lane) block
            for l in range(NUM_HIDDEN):
                whA[l, ho:ho + hs, ho:ho + hs] = np.asarray(hidden[2 * l])
                bhA[l, 0, ho:ho + hs] = np.asarray(hidden[2 * l + 1])[0]
            w2a[ho:ho + hs, so:so + ss] = np.asarray(w2_c)
        else:                                                # second (132-lane) block
            o = ho - HID_A
            for l in range(NUM_HIDDEN):
                whB[l, o:o + hs, o:o + hs] = np.asarray(hidden[2 * l])
                bhB[l, 0, o:o + hs] = np.asarray(hidden[2 * l + 1])[0]
            w2b[o:o + hs, so:so + ss] = np.asarray(w2_c)
        b2[0, so:so + ss] = np.asarray(b2_c)[0]
        e[c, so:so + ss] = 1.0

    et = np.ascontiguousarray(e.T)                           # [256, 8] per-segment sum
    e2 = np.zeros((2 * NUM_CLASSES, 2 * OUT_PAD), np.float32)  # fused scale/lse expansion
    e2[:NUM_CLASSES, :OUT_PAD] = e
    e2[NUM_CLASSES:, OUT_PAD:] = e

    cd = compute_dtype

    def dev(arr, dtype):
        return jnp.asarray(arr).astype(dtype)

    return {"wg": dev(wg, cd), "bg": dev(bg, jnp.float32),
            "cw1": dev(cw1, jnp.float32), "cb1": dev(cb1, jnp.float32),
            "cw2": dev(cw2, jnp.float32), "cb2": dev(cb2, jnp.float32),
            "w1c": dev(w1c, jnp.float32),
            "whA": dev(whA, cd), "bhA": dev(bhA, jnp.float32),
            "whB": dev(whB, cd), "bhB": dev(bhB, jnp.float32),
            "w2a": dev(w2a, cd), "w2b": dev(w2b, cd), "b2": dev(b2, jnp.float32),
            "et": dev(et, jnp.float32), "e2": dev(e2, jnp.float32)}


# ------------------------------- wrapper ---------------------------------------
_WEIGHT_ORDER = ("wg", "bg", "cw1", "cb1", "cw2", "cb2", "w1c",
                 "whA", "bhA", "whB", "bhB", "w2a", "w2b", "b2", "et", "e2")


def cuttlenet_forward(x, packed, *, block_b=None, vmem_limit_bytes=48 * 1024 * 1024):
    """x: [B, NUM_GENES] float32 expression matrix; packed: pack_inputs() output."""
    B = x.shape[0]
    if block_b is None:
        # Big blocks amortize the ~0.35 us/step grid overhead and fill the MXU
        # rows; keep >= 2 grid steps at large B so the "parallel" batch axis can
        # shard across both v7x TensorCores.  Tunable for further sweeps.
        block_b = B if B <= 256 else (256 if B <= 1024 else 512)
    nb = pl.cdiv(B, block_b)

    weights = [packed[n] for n in _WEIGHT_ORDER]

    def bcast_spec(arr):
        # Constant block (index_map always 0): DMA'd once, revisited thereafter.
        return pl.BlockSpec(arr.shape, lambda i, n=arr.ndim: (0,) * n)

    in_specs = [pl.BlockSpec((block_b, NUM_GENES), lambda i: (i, 0))]
    in_specs += [bcast_spec(w) for w in weights]
    out_spec = pl.BlockSpec((block_b, OUT_PAD), lambda i: (i, 0))

    out = pl.pallas_call(
        _cuttlenet_kernel,
        out_shape=jax.ShapeDtypeStruct((B, OUT_PAD), jnp.float32),
        grid_spec=pltpu.PrefetchScalarGridSpec(
            num_scalar_prefetch=0,
            grid=(nb,),
            in_specs=in_specs,
            out_specs=out_spec),
        compiler_params=pltpu.CompilerParams(
            dimension_semantics=("parallel",),
            vmem_limit_bytes=vmem_limit_bytes),
    )(x, *weights)
    return out[:, :TOTAL_SUBCLASSES]                 # drop lane padding


# ------------------------ deterministic parameter init -------------------------
def _init_linear(key, fan_in, fan_out):
    kw, kb = jax.random.split(key)
    bound = 1.0 / float(np.sqrt(fan_in))
    w = jax.random.uniform(kw, (fan_in, fan_out), jnp.float32, -bound, bound)  # [in, out]
    b = jax.random.uniform(kb, (1, fan_out), jnp.float32, -bound, bound)
    return w, b


def init_params(key):
    keys = jax.random.split(key, 2 + NUM_CLASSES)
    cW1, cb1 = _init_linear(keys[0], GENE_SET_SIZES["class"], CLASS_HIDDEN)
    cW2, cb2 = _init_linear(keys[1], CLASS_HIDDEN, NUM_CLASSES)
    subclass = []
    for c in range(NUM_CLASSES):
        n_genes = GENE_SET_SIZES[CLASS_GENE_SET[c]]
        s = SUB_COUNTS[c]
        hid = 2 * s
        ks = jax.random.split(keys[2 + c], 2 + NUM_HIDDEN)
        W1, b1 = _init_linear(ks[0], n_genes + NUM_CLASSES, hid)
        plist = [W1[:n_genes, :], W1[n_genes:, :], b1]           # split fc1 rows: genes / class_out
        for h in range(NUM_HIDDEN):
            hW, hb = _init_linear(ks[1 + h], hid, hid)
            plist += [hW, hb]
        W2, b2 = _init_linear(ks[1 + NUM_HIDDEN], hid, s)
        plist += [W2, b2]
        subclass.append(plist)
    return {"class_fc1_w": cW1, "class_fc1_b": cb1,
            "class_fc2_w": cW2, "class_fc2_b": cb2,
            "subclass": subclass}


def init_gene_indices(key):
    names = sorted(GENE_SET_SIZES)
    sets = {}
    for name, k in zip(names, jax.random.split(key, len(names))):
        sets[name] = jax.random.permutation(k, NUM_GENES)[:GENE_SET_SIZES[name]]
    indices = {"class_net": sets["class"]}
    for c in range(NUM_CLASSES):
        indices[c] = sets[CLASS_GENE_SET[c]]
    return indices


# ------------------------------ pure-JAX reference -----------------------------
def cuttlenet_reference(x, params, gene_indices):
    hp = jax.lax.Precision.HIGHEST
    cg = x[:, gene_indices["class_net"]]
    h = jax.nn.relu(jnp.dot(cg, params["class_fc1_w"], precision=hp) + params["class_fc1_b"])
    class_out = jax.nn.log_softmax(
        jnp.dot(h, params["class_fc2_w"], precision=hp) + params["class_fc2_b"], axis=1)
    out = jnp.zeros((x.shape[0], TOTAL_SUBCLASSES), jnp.float32)
    for c in range(NUM_CLASSES):
        W1g, W1c, b1 = params["subclass"][c][0:3]
        hidden = params["subclass"][c][3:3 + 2 * NUM_HIDDEN]
        W2, b2 = params["subclass"][c][-2:]
        xi = jnp.concatenate([x[:, gene_indices[c]], class_out], axis=1)
        W1 = jnp.concatenate([W1g, W1c], axis=0)
        a = jax.nn.relu(jnp.dot(xi, W1, precision=hp) + b1)
        a_skip = a * SKIP
        for hl in range(NUM_HIDDEN):
            a = jax.nn.relu(jnp.dot(a, hidden[2 * hl], precision=hp) + hidden[2 * hl + 1])
        a = a + a_skip
        sub_out = jax.nn.log_softmax(jnp.dot(a, W2, precision=hp) + b2, axis=1)
        out = out.at[:, OFFSETS[c]:OFFSETS[c] + SUB_COUNTS[c]].set(sub_out * class_out[:, c:c + 1])
    return out


# ---------------------------------- main ---------------------------------------
if __name__ == "__main__":
    key = jax.random.PRNGKey(0)
    k_idx, k_param, k_x = jax.random.split(key, 3)

    gene_indices = init_gene_indices(k_idx)
    params = init_params(k_param)

    B = 8
    x = jax.random.uniform(k_x, (B, NUM_GENES), jnp.float32)     # [batch, genes]
    ref = jax.block_until_ready(cuttlenet_reference(x, params, gene_indices))

    # 1) exactness check of the restructured kernel with f32 weights
    packed_f32 = pack_inputs(params, gene_indices, compute_dtype=jnp.float32)
    out_f32 = jax.block_until_ready(cuttlenet_forward(x, packed_f32))
    assert out_f32.shape == (B, TOTAL_SUBCLASSES)
    np.testing.assert_allclose(np.asarray(out_f32), np.asarray(ref), atol=5e-3, rtol=5e-3)

    # 2) production config: bf16 MXU operands on the big dots (f32 accumulate,
    #    f32 softmax math) -> looser tolerance vs. the f32 reference.
    packed = pack_inputs(params, gene_indices, compute_dtype=jnp.bfloat16)
    out = jax.block_until_ready(cuttlenet_forward(x, packed))
    assert out.shape == (B, TOTAL_SUBCLASSES)
    assert bool(jnp.all(jnp.isfinite(out)))
    np.testing.assert_allclose(np.asarray(out), np.asarray(ref), atol=2e-2, rtol=2e-2)

    print("KERNEL_OK")
</pallas_src>

<mosaic_0001>
module attributes {stable_mosaic.version = 11 : i64} {
  func.func @_cuttlenet_kernel(%arg0: i32, %arg1: memref<8x64xf32, #tpu.memory_space<vmem>>, %arg2: memref<64x260xf32, #tpu.memory_space<vmem>>, %arg3: memref<1x260xf32, #tpu.memory_space<vmem>>, %arg4: memref<64x16xf32, #tpu.memory_space<vmem>>, %arg5: memref<1x16xf32, #tpu.memory_space<vmem>>, %arg6: memref<16x8xf32, #tpu.memory_space<vmem>>, %arg7: memref<1x8xf32, #tpu.memory_space<vmem>>, %arg8: memref<8x260xf32, #tpu.memory_space<vmem>>, %arg9: memref<2x128x128xf32, #tpu.memory_space<vmem>>, %arg10: memref<2x1x128xf32, #tpu.memory_space<vmem>>, %arg11: memref<2x132x132xf32, #tpu.memory_space<vmem>>, %arg12: memref<2x1x132xf32, #tpu.memory_space<vmem>>, %arg13: memref<128x256xf32, #tpu.memory_space<vmem>>, %arg14: memref<132x256xf32, #tpu.memory_space<vmem>>, %arg15: memref<1x256xf32, #tpu.memory_space<vmem>>, %arg16: memref<256x8xf32, #tpu.memory_space<vmem>>, %arg17: memref<16x512xf32, #tpu.memory_space<vmem>>, %arg18: memref<8x256xf32, #tpu.memory_space<vmem>>) attributes {dimension_semantics = [#tpu.dimension_semantics<parallel>], iteration_bounds = array<i64: 1>, scalar_prefetch = 0 : i64, scratch_operands = 0 : i64, tpu.core_type = #tpu.core_type<tc>, window_params = [{transform_indices = @transform_0, window_bounds = array<i64: 8, 64>}, {pipeline_mode = #tpu.pipeline_mode<synchronous>, transform_indices = @transform_1, window_bounds = array<i64: 64, 260>}, {pipeline_mode = #tpu.pipeline_mode<synchronous>, transform_indices = @transform_2, window_bounds = array<i64: 1, 260>}, {pipeline_mode = #tpu.pipeline_mode<synchronous>, transform_indices = @transform_3, window_bounds = array<i64: 64, 16>}, {pipeline_mode = #tpu.pipeline_mode<synchronous>, transform_indices = @transform_4, window_bounds = array<i64: 1, 16>}, {pipeline_mode = #tpu.pipeline_mode<synchronous>, transform_indices = @transform_5, window_bounds = array<i64: 16, 8>}, {pipeline_mode = #tpu.pipeline_mode<synchronous>, transform_indices = @transform_6, window_bounds = array<i64: 1, 8>}, {pipeline_mode = #tpu.pipeline_mode<synchronous>, transform_indices = @transform_7, window_bounds = array<i64: 8, 260>}, {pipeline_mode = #tpu.pipeline_mode<synchronous>, transform_indices = @transform_8, window_bounds = array<i64: 2, 128, 128>}, {pipeline_mode = #tpu.pipeline_mode<synchronous>, transform_indices = @transform_9, window_bounds = array<i64: 2, 1, 128>}, {pipeline_mode = #tpu.pipeline_mode<synchronous>, transform_indices = @transform_10, window_bounds = array<i64: 2, 132, 132>}, {pipeline_mode = #tpu.pipeline_mode<synchronous>, transform_indices = @transform_11, window_bounds = array<i64: 2, 1, 132>}, {pipeline_mode = #tpu.pipeline_mode<synchronous>, transform_indices = @transform_12, window_bounds = array<i64: 128, 256>}, {pipeline_mode = #tpu.pipeline_mode<synchronous>, transform_indices = @transform_13, window_bounds = array<i64: 132, 256>}, {pipeline_mode = #tpu.pipeline_mode<synchronous>, transform_indices = @transform_14, window_bounds = array<i64: 1, 256>}, {pipeline_mode = #tpu.pipeline_mode<synchronous>, transform_indices = @transform_15, window_bounds = array<i64: 256, 8>}, {pipeline_mode = #tpu.pipeline_mode<synchronous>, transform_indices = @transform_16, window_bounds = array<i64: 16, 512>}, {transform_indices = @transform_17, window_bounds = array<i64: 8, 256>}]} {
    %c0 = arith.constant 0 : index
    %c0_0 = arith.constant 0 : index
    %0 = vector.load %arg1[%c0, %c0_0] : memref<8x64xf32, #tpu.memory_space<vmem>>, vector<8x64xf32>
    %c0_1 = arith.constant 0 : index
    %c0_2 = arith.constant 0 : index
    %1 = vector.load %arg2[%c0_1, %c0_2] : memref<64x260xf32, #tpu.memory_space<vmem>>, vector<64x260xf32>
    %cst = arith.constant dense<0.000000e+00> : vector<8x260xf32>
    %2 = tpu.matmul %0, %1, %cst {dimension_numbers = #tpu.dot_dimension_numbers<[1], [0], [0], [1], [0, 0, 1, 1], [], []>} : vector<8x64xf32>, vector<64x260xf32>, vector<8x260xf32> -> vector<8x260xf32>
    %c0_3 = arith.constant 0 : index
    %c0_4 = arith.constant 0 : index
    %3 = vector.load %arg3[%c0_3, %c0_4] : memref<1x260xf32, #tpu.memory_space<vmem>>, vector<1x260xf32>
    %4 = vector.broadcast %3 : vector<1x260xf32> to vector<8x260xf32>
    %5 = arith.addf %2, %4 : vector<8x260xf32>
    %c0_5 = arith.constant 0 : index
    %c0_6 = arith.constant 0 : index
    %6 = vector.load %arg4[%c0_5, %c0_6] : memref<64x16xf32, #tpu.memory_space<vmem>>, vector<64x16xf32>
    %cst_7 = arith.constant dense<0.000000e+00> : vector<8x16xf32>
    %7 = tpu.matmul %0, %6, %cst_7 {dimension_numbers = #tpu.dot_dimension_numbers<[1], [0], [0], [1], [0, 0, 1, 1], [], []>} : vector<8x64xf32>, vector<64x16xf32>, vector<8x16xf32> -> vector<8x16xf32>
    %c0_8 = arith.constant 0 : index
    %c0_9 = arith.constant 0 : index
    %8 = vector.load %arg5[%c0_8, %c0_9] : memref<1x16xf32, #tpu.memory_space<vmem>>, vector<1x16xf32>
    %9 = vector.broadcast %8 : vector<1x16xf32> to vector<8x16xf32>
    %10 = arith.addf %7, %9 : vector<8x16xf32>
    %cst_10 = arith.constant 0.000000e+00 : f32
    %11 = vector.broadcast %cst_10 : f32 to vector<8x16xf32>
    %12 = arith.maximumf %10, %11 : vector<8x16xf32>
    %c0_11 = arith.constant 0 : index
    %c0_12 = arith.constant 0 : index
    %13 = vector.load %arg6[%c0_11, %c0_12] : memref<16x8xf32, #tpu.memory_space<vmem>>, vector<16x8xf32>
    %cst_13 = arith.constant dense<0.000000e+00> : vector<8x8xf32>
    %14 = tpu.matmul %12, %13, %cst_13 {dimension_numbers = #tpu.dot_dimension_numbers<[1], [0], [0], [1], [0, 0, 1, 1], [], []>} : vector<8x16xf32>, vector<16x8xf32>, vector<8x8xf32> -> vector<8x8xf32>
    %c0_14 = arith.constant 0 : index
    %c0_15 = arith.constant 0 : index
    %15 = vector.load %arg7[%c0_14, %c0_15] : memref<1x8xf32, #tpu.memory_space<vmem>>, vector<1x8xf32>
    %16 = vector.broadcast %15 : vector<1x8xf32> to vector<8x8xf32>
    %17 = arith.addf %14, %16 : vector<8x8xf32>
    %cst_16 = arith.constant dense<0xFF800000> : vector<8xf32>
    %18 = vector.multi_reduction <maximumf>, %17, %cst_16 [1] : vector<8x8xf32> to vector<8xf32>
    %19 = vector.shape_cast %18 : vector<8xf32> to vector<8x1xf32>
    %20 = vector.broadcast %19 : vector<8x1xf32> to vector<8x8xf32>
    %21 = arith.subf %17, %20 : vector<8x8xf32>
    %22 = math.exp %21 : vector<8x8xf32>
    %cst_17 = arith.constant dense<0.000000e+00> : vector<8xf32>
    %23 = vector.multi_reduction <add>, %22, %cst_17 [1] : vector<8x8xf32> to vector<8xf32>
    %24 = vector.shape_cast %23 : vector<8xf32> to vector<8x1xf32>
    %25 = math.log %24 : vector<8x1xf32>
    %26 = vector.broadcast %25 : vector<8x1xf32> to vector<8x8xf32>
    %27 = arith.subf %21, %26 : vector<8x8xf32>
    %c0_18 = arith.constant 0 : index
    %c0_19 = arith.constant 0 : index
    %28 = vector.load %arg8[%c0_18, %c0_19] : memref<8x260xf32, #tpu.memory_space<vmem>>, vector<8x260xf32>
    %cst_20 = arith.constant dense<0.000000e+00> : vector<8x260xf32>
    %29 = tpu.matmul %27, %28, %cst_20 {dimension_numbers = #tpu.dot_dimension_numbers<[1], [0], [0], [1], [0, 0, 1, 1], [], []>} : vector<8x8xf32>, vector<8x260xf32>, vector<8x260xf32> -> vector<8x260xf32>
    %30 = arith.addf %5, %29 : vector<8x260xf32>
    %cst_21 = arith.constant 0.000000e+00 : f32
    %31 = vector.broadcast %cst_21 : f32 to vector<8x260xf32>
    %32 = arith.maximumf %30, %31 : vector<8x260xf32>
    %33 = vector.extract_strided_slice %32 {offsets = [0, 0], sizes = [8, 128], strides = [1, 1]} : vector<8x260xf32> to vector<8x128xf32>
    %34 = vector.extract_strided_slice %32 {offsets = [0, 128], sizes = [8, 132], strides = [1, 1]} : vector<8x260xf32> to vector<8x132xf32>
    %cst_22 = arith.constant 1.000000e+00 : f32
    %35 = vector.broadcast %cst_22 : f32 to vector<8x128xf32>
    %36 = arith.mulf %33, %35 : vector<8x128xf32>
    %cst_23 = arith.constant 1.000000e+00 : f32
    %37 = vector.broadcast %cst_23 : f32 to vector<8x132xf32>
    %38 = arith.mulf %34, %37 : vector<8x132xf32>
    %c0_24 = arith.constant 0 : index
    %c0_25 = arith.constant 0 : index
    %c0_26 = arith.constant 0 : index
    %39 = vector.load %arg9[%c0_24, %c0_25, %c0_26] : memref<2x128x128xf32, #tpu.memory_space<vmem>>, vector<1x128x128xf32>
    %40 = vector.shape_cast %39 : vector<1x128x128xf32> to vector<128x128xf32>
    %cst_27 = arith.constant dense<0.000000e+00> : vector<8x128xf32>
    %41 = tpu.matmul %33, %40, %cst_27 {dimension_numbers = #tpu.dot_dimension_numbers<[1], [0], [0], [1], [0, 0, 1, 1], [], []>} : vector<8x128xf32>, vector<128x128xf32>, vector<8x128xf32> -> vector<8x128xf32>
    %c0_28 = arith.constant 0 : index
    %c0_29 = arith.constant 0 : index
    %c0_30 = arith.constant 0 : index
    %42 = vector.load %arg10[%c0_28, %c0_29, %c0_30] : memref<2x1x128xf32, #tpu.memory_space<vmem>>, vector<1x1x128xf32>
    %43 = vector.shape_cast %42 : vector<1x1x128xf32> to vector<1x128xf32>
    %44 = vector.broadcast %43 : vector<1x128xf32> to vector<8x128xf32>
    %45 = arith.addf %41, %44 : vector<8x128xf32>
    %cst_31 = arith.constant 0.000000e+00 : f32
    %46 = vector.broadcast %cst_31 : f32 to vector<8x128xf32>
    %47 = arith.maximumf %45, %46 : vector<8x128xf32>
    %c0_32 = arith.constant 0 : index
    %c0_33 = arith.constant 0 : index
    %c0_34 = arith.constant 0 : index
    %48 = vector.load %arg11[%c0_32, %c0_33, %c0_34] : memref<2x132x132xf32, #tpu.memory_space<vmem>>, vector<1x132x132xf32>
    %49 = vector.shape_cast %48 : vector<1x132x132xf32> to vector<132x132xf32>
    %cst_35 = arith.constant dense<0.000000e+00> : vector<8x132xf32>
    %50 = tpu.matmul %34, %49, %cst_35 {dimension_numbers = #tpu.dot_dimension_numbers<[1], [0], [0], [1], [0, 0, 1, 1], [], []>} : vector<8x132xf32>, vector<132x132xf32>, vector<8x132xf32> -> vector<8x132xf32>
    %c0_36 = arith.constant 0 : index
    %c0_37 = arith.constant 0 : index
    %c0_38 = arith.constant 0 : index
    %51 = vector.load %arg12[%c0_36, %c0_37, %c0_38] : memref<2x1x132xf32, #tpu.memory_space<vmem>>, vector<1x1x132xf32>
    %52 = vector.shape_cast %51 : vector<1x1x132xf32> to vector<1x132xf32>
    %53 = vector.broadcast %52 : vector<1x132xf32> to vector<8x132xf32>
    %54 = arith.addf %50, %53 : vector<8x132xf32>
    %cst_39 = arith.constant 0.000000e+00 : f32
    %55 = vector.broadcast %cst_39 : f32 to vector<8x132xf32>
    %56 = arith.maximumf %54, %55 : vector<8x132xf32>
    %c1 = arith.constant 1 : index
    %c0_40 = arith.constant 0 : index
    %c0_41 = arith.constant 0 : index
    %57 = vector.load %arg9[%c1, %c0_40, %c0_41] : memref<2x128x128xf32, #tpu.memory_space<vmem>>, vector<1x128x128xf32>
    %58 = vector.shape_cast %57 : vector<1x128x128xf32> to vector<128x128xf32>
    %cst_42 = arith.constant dense<0.000000e+00> : vector<8x128xf32>
    %59 = tpu.matmul %47, %58, %cst_42 {dimension_numbers = #tpu.dot_dimension_numbers<[1], [0], [0], [1], [0, 0, 1, 1], [], []>} : vector<8x128xf32>, vector<128x128xf32>, vector<8x128xf32> -> vector<8x128xf32>
    %c1_43 = arith.constant 1 : index
    %c0_44 = arith.constant 0 : index
    %c0_45 = arith.constant 0 : index
    %60 = vector.load %arg10[%c1_43, %c0_44, %c0_45] : memref<2x1x128xf32, #tpu.memory_space<vmem>>, vector<1x1x128xf32>
    %61 = vector.shape_cast %60 : vector<1x1x128xf32> to vector<1x128xf32>
    %62 = vector.broadcast %61 : vector<1x128xf32> to vector<8x128xf32>
    %63 = arith.addf %59, %62 : vector<8x128xf32>
    %cst_46 = arith.constant 0.000000e+00 : f32
    %64 = vector.broadcast %cst_46 : f32 to vector<8x128xf32>
    %65 = arith.maximumf %63, %64 : vector<8x128xf32>
    %c1_47 = arith.constant 1 : index
    %c0_48 = arith.constant 0 : index
    %c0_49 = arith.constant 0 : index
    %66 = vector.load %arg11[%c1_47, %c0_48, %c0_49] : memref<2x132x132xf32, #tpu.memory_space<vmem>>, vector<1x132x132xf32>
    %67 = vector.shape_cast %66 : vector<1x132x132xf32> to vector<132x132xf32>
    %cst_50 = arith.constant dense<0.000000e+00> : vector<8x132xf32>
    %68 = tpu.matmul %56, %67, %cst_50 {dimension_numbers = #tpu.dot_dimension_numbers<[1], [0], [0], [1], [0, 0, 1, 1], [], []>} : vector<8x132xf32>, vector<132x132xf32>, vector<8x132xf32> -> vector<8x132xf32>
    %c1_51 = arith.constant 1 : index
    %c0_52 = arith.constant 0 : index
    %c0_53 = arith.constant 0 : index
    %69 = vector.load %arg12[%c1_51, %c0_52, %c0_53] : memref<2x1x132xf32, #tpu.memory_space<vmem>>, vector<1x1x132xf32>
    %70 = vector.shape_cast %69 : vector<1x1x132xf32> to vector<1x132xf32>
    %71 = vector.broadcast %70 : vector<1x132xf32> to vector<8x132xf32>
    %72 = arith.addf %68, %71 : vector<8x132xf32>
    %cst_54 = arith.constant 0.000000e+00 : f32
    %73 = vector.broadcast %cst_54 : f32 to vector<8x132xf32>
    %74 = arith.maximumf %72, %73 : vector<8x132xf32>
    %75 = arith.addf %65, %36 : vector<8x128xf32>
    %76 = arith.addf %74, %38 : vector<8x132xf32>
    %c0_55 = arith.constant 0 : index
    %c0_56 = arith.constant 0 : index
    %77 = vector.load %arg13[%c0_55, %c0_56] : memref<128x256xf32, #tpu.memory_space<vmem>>, vector<128x256xf32>
    %cst_57 = arith.constant dense<0.000000e+00> : vector<8x256xf32>
    %78 = tpu.matmul %75, %77, %cst_57 {dimension_numbers = #tpu.dot_dimension_numbers<[1], [0], [0], [1], [0, 0, 1, 1], [], []>} : vector<8x128xf32>, vector<128x256xf32>, vector<8x256xf32> -> vector<8x256xf32>
    %c0_58 = arith.constant 0 : index
    %c0_59 = arith.constant 0 : index
    %79 = vector.load %arg14[%c0_58, %c0_59] : memref<132x256xf32, #tpu.memory_space<vmem>>, vector<132x256xf32>
    %cst_60 = arith.constant dense<0.000000e+00> : vector<8x256xf32>
    %80 = tpu.matmul %76, %79, %cst_60 {dimension_numbers = #tpu.dot_dimension_numbers<[1], [0], [0], [1], [0, 0, 1, 1], [], []>} : vector<8x132xf32>, vector<132x256xf32>, vector<8x256xf32> -> vector<8x256xf32>
    %81 = arith.addf %78, %80 : vector<8x256xf32>
    %c0_61 = arith.constant 0 : index
    %c0_62 = arith.constant 0 : index
    %82 = vector.load %arg15[%c0_61, %c0_62] : memref<1x256xf32, #tpu.memory_space<vmem>>, vector<1x256xf32>
    %83 = vector.broadcast %82 : vector<1x256xf32> to vector<8x256xf32>
    %84 = arith.addf %81, %83 : vector<8x256xf32>
    %cst_63 = arith.constant dense<0xFF800000> : vector<8xf32>
    %85 = vector.multi_reduction <maximumf>, %84, %cst_63 [1] : vector<8x256xf32> to vector<8xf32>
    %86 = vector.shape_cast %85 : vector<8xf32> to vector<8x1xf32>
    %87 = vector.broadcast %86 : vector<8x1xf32> to vector<8x256xf32>
    %88 = arith.subf %84, %87 : vector<8x256xf32>
    %89 = math.exp %88 : vector<8x256xf32>
    %c0_64 = arith.constant 0 : index
    %c0_65 = arith.constant 0 : index
    %90 = vector.load %arg16[%c0_64, %c0_65] : memref<256x8xf32, #tpu.memory_space<vmem>>, vector<256x8xf32>
    %cst_66 = arith.constant dense<0.000000e+00> : vector<8x8xf32>
    %91 = tpu.matmul %89, %90, %cst_66 {dimension_numbers = #tpu.dot_dimension_numbers<[1], [0], [0], [1], [0, 0, 1, 1], [], []>} : vector<8x256xf32>, vector<256x8xf32>, vector<8x8xf32> -> vector<8x8xf32>
    %92 = math.log %91 : vector<8x8xf32>
    %93 = vector.broadcast %86 : vector<8x1xf32> to vector<8x8xf32>
    %94 = arith.addf %93, %92 : vector<8x8xf32>
    %95 = tpu.concatenate %27, %94 in 1 : vector<8x8xf32>, vector<8x8xf32> -> vector<8x16xf32>
    %c0_67 = arith.constant 0 : index
    %c0_68 = arith.constant 0 : index
    %96 = vector.load %arg17[%c0_67, %c0_68] : memref<16x512xf32, #tpu.memory_space<vmem>>, vector<16x512xf32>
    %cst_69 = arith.constant dense<0.000000e+00> : vector<8x512xf32>
    %97 = tpu.matmul %95, %96, %cst_69 {dimension_numbers = #tpu.dot_dimension_numbers<[1], [0], [0], [1], [0, 0, 1, 1], [], []>} : vector<8x16xf32>, vector<16x512xf32>, vector<8x512xf32> -> vector<8x512xf32>
    %98 = vector.extract_strided_slice %97 {offsets = [0, 0], sizes = [8, 256], strides = [1, 1]} : vector<8x512xf32> to vector<8x256xf32>
    %99 = vector.extract_strided_slice %97 {offsets = [0, 256], sizes = [8, 256], strides = [1, 1]} : vector<8x512xf32> to vector<8x256xf32>
    %100 = arith.subf %84, %99 : vector<8x256xf32>
    %101 = arith.mulf %100, %98 : vector<8x256xf32>
    %c0_70 = arith.constant 0 : index
    %c0_71 = arith.constant 0 : index
    %102 = vector.load %arg18[%c0_70, %c0_71] : memref<8x256xf32, #tpu.memory_space<vmem>>, vector<8x256xf32>
    tpu.vector_store %arg18[%c0_70, %c0_71], %101 {strides = array<i32>} : memref<8x256xf32, #tpu.memory_space<vmem>>, vector<8x256xf32>,
    return
  }
  func.func @transform_0(%arg0: i32) -> (i32, i32) {
    %c0_i32 = arith.constant 0 : i32
    %c0_i32_0 = arith.constant 0 : i32
    return %arg0, %c0_i32 : i32, i32
  }
  func.func @transform_1(%arg0: i32) -> (i32, i32) {
    %c0_i32 = arith.constant 0 : i32
    %c0_i32_0 = arith.constant 0 : i32
    %c0_i32_1 = arith.constant 0 : i32
    return %c0_i32, %c0_i32_0 : i32, i32
  }
  func.func @transform_2(%arg0: i32) -> (i32, i32) {
    %c0_i32 = arith.constant 0 : i32
    %c0_i32_0 = arith.constant 0 : i32
    %c0_i32_1 = arith.constant 0 : i32
    return %c0_i32, %c0_i32_0 : i32, i32
  }
  func.func @transform_3(%arg0: i32) -> (i32, i32) {
    %c0_i32 = arith.constant 0 : i32
    %c0_i32_0 = arith.constant 0 : i32
    %c0_i32_1 = arith.constant 0 : i32
    return %c0_i32, %c0_i32_0 : i32, i32
  }
  func.func @transform_4(%arg0: i32) -> (i32, i32) {
    %c0_i32 = arith.constant 0 : i32
    %c0_i32_0 = arith.constant 0 : i32
    %c0_i32_1 = arith.constant 0 : i32
    return %c0_i32, %c0_i32_0 : i32, i32
  }
  func.func @transform_5(%arg0: i32) -> (i32, i32) {
    %c0_i32 = arith.constant 0 : i32
    %c0_i32_0 = arith.constant 0 : i32
    %c0_i32_1 = arith.constant 0 : i32
    return %c0_i32, %c0_i32_0 : i32, i32
  }
  func.func @transform_6(%arg0: i32) -> (i32, i32) {
    %c0_i32 = arith.constant 0 : i32
    %c0_i32_0 = arith.constant 0 : i32
    %c0_i32_1 = arith.constant 0 : i32
    return %c0_i32, %c0_i32_0 : i32, i32
  }
  func.func @transform_7(%arg0: i32) -> (i32, i32) {
    %c0_i32 = arith.constant 0 : i32
    %c0_i32_0 = arith.constant 0 : i32
    %c0_i32_1 = arith.constant 0 : i32
    return %c0_i32, %c0_i32_0 : i32, i32
  }
  func.func @transform_8(%arg0: i32) -> (i32, i32, i32) {
    %c0_i32 = arith.constant 0 : i32
    %c0_i32_0 = arith.constant 0 : i32
    %c0_i32_1 = arith.constant 0 : i32
    %c0_i32_2 = arith.constant 0 : i32
    return %c0_i32, %c0_i32_0, %c0_i32_1 : i32, i32, i32
  }
  func.func @transform_9(%arg0: i32) -> (i32, i32, i32) {
    %c0_i32 = arith.constant 0 : i32
    %c0_i32_0 = arith.constant 0 : i32
    %c0_i32_1 = arith.constant 0 : i32
    %c0_i32_2 = arith.constant 0 : i32
    return %c0_i32, %c0_i32_0, %c0_i32_1 : i32, i32, i32
  }
  func.func @transform_10(%arg0: i32) -> (i32, i32, i32) {
    %c0_i32 = arith.constant 0 : i32
    %c0_i32_0 = arith.constant 0 : i32
    %c0_i32_1 = arith.constant 0 : i32
    %c0_i32_2 = arith.constant 0 : i32
    return %c0_i32, %c0_i32_0, %c0_i32_1 : i32, i32, i32
  }
  func.func @transform_11(%arg0: i32) -> (i32, i32, i32) {
    %c0_i32 = arith.constant 0 : i32
    %c0_i32_0 = arith.constant 0 : i32
    %c0_i32_1 = arith.constant 0 : i32
    %c0_i32_2 = arith.constant 0 : i32
    return %c0_i32, %c0_i32_0, %c0_i32_1 : i32, i32, i32
  }
  func.func @transform_12(%arg0: i32) -> (i32, i32) {
    %c0_i32 = arith.constant 0 : i32
    %c0_i32_0 = arith.constant 0 : i32
    %c0_i32_1 = arith.constant 0 : i32
    return %c0_i32, %c0_i32_0 : i32, i32
  }
  func.func @transform_13(%arg0: i32) -> (i32, i32) {
    %c0_i32 = arith.constant 0 : i32
    %c0_i32_0 = arith.constant 0 : i32
    %c0_i32_1 = arith.constant 0 : i32
    return %c0_i32, %c0_i32_0 : i32, i32
  }
  func.func @transform_14(%arg0: i32) -> (i32, i32) {
    %c0_i32 = arith.constant 0 : i32
    %c0_i32_0 = arith.constant 0 : i32
    %c0_i32_1 = arith.constant 0 : i32
    return %c0_i32, %c0_i32_0 : i32, i32
  }
  func.func @transform_15(%arg0: i32) -> (i32, i32) {
    %c0_i32 = arith.constant 0 : i32
    %c0_i32_0 = arith.constant 0 : i32
    %c0_i32_1 = arith.constant 0 : i32
    return %c0_i32, %c0_i32_0 : i32, i32
  }
  func.func @transform_16(%arg0: i32) -> (i32, i32) {
    %c0_i32 = arith.constant 0 : i32
    %c0_i32_0 = arith.constant 0 : i32
    %c0_i32_1 = arith.constant 0 : i32
    return %c0_i32, %c0_i32_0 : i32, i32
  }
  func.func @transform_17(%arg0: i32) -> (i32, i32) {
    %c0_i32 = arith.constant 0 : i32
    %c0_i32_0 = arith.constant 0 : i32
    return %arg0, %c0_i32 : i32, i32
  }
}

</mosaic_0001>

<bundles_post_ra>
// kernel: tpu_custom_call.1
= control target key start
LH: loop header
LB: loop body
LE: loop exit
PB: predicated region body
PF: predicated region fallthrough
CT: control target
= control target key end

     0   :  { %s3129_s0 = inlined_call_operand.vmem [shape: f32[8,64], index: 0, kind: input, shape index: {}]   ;;  %s3130_s1 = inlined_call_operand.vmem [shape: f32[64,260], index: 1, kind: input, shape index: {}]   ;;  %s3131_s2 = inlined_call_operand.vmem [shape: f32[1,260], index: 2, kind: input, shape index: {}]   ;;  %s3132_s3 = inlined_call_operand.vmem [shape: f32[64,16], index: 3, kind: input, shape index: {}]   ;;  %s3133_s4 = inlined_call_operand.vmem [shape: f32[1,16], index: 4, kind: input, shape index: {}]   ;;  %s3134_s5 = inlined_call_operand.vmem [shape: f32[16,8], index: 5, kind: input, shape index: {}]   ;;  %s3135_s6 = inlined_call_operand.vmem [shape: f32[1,8], index: 6, kind: input, shape index: {}]   ;;  %s3136_s7 = inlined_call_operand.vmem [shape: f32[8,260], index: 7, kind: input, shape index: {}]   ;;  %s3137_s8 = inlined_call_operand.vmem [shape: f32[2,128,128], index: 8, kind: input, shape index: {}]   ;;  %s3138_s9 = inlined_call_operand.vmem [shape: f32[2,1,128], index: 9, kind: input, shape index: {}]   ;;  %s3139_s10 = inlined_call_operand.vmem [shape: f32[2,132,132], index: 10, kind: input, shape index: {}]   ;;  %s3140_s11 = inlined_call_operand.vmem [shape: f32[2,1,132], index: 11, kind: input, shape index: {}]   ;;  %s3141_s12 = inlined_call_operand.vmem [shape: f32[128,256], index: 12, kind: input, shape index: {}]   ;;  %s3142_s13 = inlined_call_operand.vmem [shape: f32[132,256], index: 13, kind: input, shape index: {}]   ;;  %s3143_s14 = inlined_call_operand.vmem [shape: f32[1,256], index: 14, kind: input, shape index: {}]   ;;  %s3144_s15 = inlined_call_operand.vmem [shape: f32[256,8], index: 15, kind: input, shape index: {}]   ;;  %s3145_s16 = inlined_call_operand.vmem [shape: f32[16,512], index: 16, kind: input, shape index: {}]   ;;  %s3146_s17 = inlined_call_operand.hbm [shape: f32[8,256], index: 17, kind: output, shape index: {}]  }
   0x1   :  { %3148 = sst [smem:[#allocation5_spill]] %s3129_s0 }
   0x2   :  { %3149 = sst [smem:[#allocation6_spill]] %s3130_s1 }
   0x3   :  { %s3150_s26 = sld [smem:[#allocation6_spill]]  ;;  %v2147_v7 = vmov 0.0   ;;  %v2148_v8 = vmov 0.0|0.0   ;;  %vm2149_vm0 = vmmov 0  }
   0x4   :  { %167 = vmatprep.mubr.f32.mxu0 %v2147_v7  ;;  %1856 = vmatprep.subr.bf16.mxu1 %v2148_v8 }
   0x5   :  { %1736 = vmatprep.mubr.msk.f32.mxu1 %vm2149_vm0, %v2147_v7 }
   0x9   :  { %v59_v0 = vld [vmem:[%s3150_s26 + $0x8] sm:$0xff]  ;;  %v62_v1 = vld [vmem:[%s3150_s26 + $0x20] sm:$0xff]  ;;  %v61_v4 = vld [vmem:[%s3150_s26 + $0x18] sm:$0xff] }
   0xa   :  { %v58_v2 = vld [vmem:[%s3150_s26] sm:$0xff]  ;;  %v1840_v3 = vpack.c.bf16 %v62_v1, %v59_v0  ;;  %v65_v5 = vld [vmem:[%s3150_s26 + $0x38] sm:$0xff]  ;;  %v68_v6 = vld [vmem:[%s3150_s26 + $0x50] sm:$0xff] }
   0xb   :  { %v1842_v9 = vpack.c.bf16 %v61_v4, %v58_v2  ;;  %v1844_v10 = vpack.c.bf16 %v68_v6, %v65_v5  ;;  %v64_v11 = vld [vmem:[%s3150_s26 + $0x30] sm:$0xff]  ;;  %v67_v12 = vld [vmem:[%s3150_s26 + $0x48] sm:$0xff]  ;;  %v74_v14 = vld [vmem:[%s3150_s26 + $0x80] sm:$0xff] }
   0xc   :  { %v71_v13 = vld [vmem:[%s3150_s26 + $0x68] sm:$0xff]  ;;  %1841 = vmatprep.subr.bf16.mxu0 %v1840_v3  ;;  %v1846_v15 = vpack.c.bf16 %v67_v12, %v64_v11  ;;  %v70_v17 = vld [vmem:[%s3150_s26 + $0x60] sm:$0xff]  ;;  %v73_v18 = vld [vmem:[%s3150_s26 + $0x78] sm:$0xff] }
   0xd   :  { %1843 = vmatpush1.bf16.msra.mxu0 %v1842_v9  ;;  %v1848_v16 = vpack.c.bf16 %v74_v14, %v71_v13  ;;  %v77_v19 = vld [vmem:[%s3150_s26 + $0x98] sm:$0xff]  ;;  %v80_v20 = vld [vmem:[%s3150_s26 + $0xb0] sm:$0xff]  ;;  %v1850_v21 = vpack.c.bf16 %v73_v18, %v70_v17 }
   0xe   :  { %1845 = vmatprep.subr.bf16.mxu0 %v1844_v10 }
  0x11   :  { %1847 = vmatpush1.bf16.msra.mxu0 %v1846_v15 }
  0x12   :  { %22 = vsyncpa [#allocation3], 0  ;;  %1849 = vmatprep.subr.bf16.mxu0 %v1848_v16  ;;  %v1852_v22 = vpack.c.bf16 %v80_v20, %v77_v19  ;;  %v76_v23 = vld [vmem:[%s3150_s26 + $0x90] sm:$0xff]  ;;  %v79_v24 = vld [vmem:[%s3150_s26 + $0xa8] sm:$0xff]  ;;  %s3151_s20 = sld [smem:[#allocation5_spill]]  ;;  %vm99_vm1 = vcmask 523264  }
  0x13   :  { %v1854_v25 = vpack.c.bf16 %v79_v24, %v76_v23  ;;  %v244_v26 = vld [vmem:[%s3132_s3] sm:$0xff]  ;;  %v245_v27 = vld [vmem:[%s3132_s3 + $0x8] sm:$0xff]  ;;  %v246_v30 = vld [vmem:[%s3132_s3 + $0x10] sm:$0xff]  ;;  %vm339_vm2 = vcmask 130048   ;;  %vm413_vm3 = vcmask 64512   ;;  %vm723_vm4 = vcmask 1043456  }
  0x14   :  { %v1869_v29 = vpack.c.bf16 %v245_v27, %v244_v26  ;;  %v247_v31 = vld [vmem:[%s3132_s3 + $0x18] sm:$0xff]  ;;  %v248_v33 = vld [vmem:[%s3132_s3 + $0x20] sm:$0xff]  ;;  %v249_v34 = vld [vmem:[%s3132_s3 + $0x28] sm:$0xff]  ;;  %vm719_vm5 = vcmask 31744   ;;  %s2150_s1 = smov 8  }
  0x15   :  { %1851 = vmatpush1.bf16.msra.mxu0 %v1850_v21  ;;  %v1872_v32 = vpack.c.bf16 %v247_v31, %v246_v30  ;;  %v1875_v35 = vpack.c.bf16 %v249_v34, %v248_v33  ;;  %v250_v36 = vld [vmem:[%s3132_s3 + $0x30] sm:$0xff]  ;;  %v251_v37 = vld [vmem:[%s3132_s3 + $0x38] sm:$0xff]  ;;  %v330_v39 = vld [vmem:[%s3134_s5] sm:$0xff] }
  0x16   :  { %1853 = vmatprep.subr.bf16.mxu0 %v1852_v22  ;;  %v1878_v38 = vpack.c.bf16 %v251_v37, %v250_v36  ;;  %v331_v40 = vld [vmem:[%s3134_s5 + $0x8] sm:$0xff]  ;;  %v1557_v42 = vld [vmem:[%s3133_s4] ss:$0 sm:$0xff]  ;;  %v60_v52 = vld [vmem:[%s3150_s26 + $0x10] sm:$0xff] }
  0x17   :  { %v1881_v41 = vpack.c.bf16 %v331_v40, %v330_v39  ;;  %v1559_v47 = vld [vmem:[%s3135_s6] ss:$0 sm:$0xff]  ;;  %v63_v53 = vld [vmem:[%s3150_s26 + $0x28] sm:$0xff]  ;;  %v69_v56 = vld [vmem:[%s3150_s26 + $0x58] sm:$0xff] }
  0x18   :  { %v2303_v28 = vld [vmem:[%s3151_s20] sm:$0xff]  ;;  %v1857_v55 = vpack.c.bf16 %v63_v53, %v60_v52  ;;  %v72_v58 = vld [vmem:[%s3150_s26 + $0x70] sm:$0xff]  ;;  %v75_v59 = vld [vmem:[%s3150_s26 + $0x88] sm:$0xff] }
  0x19   :  { %1855 = vmatpush1.bf16.msra.mxu0 %v1854_v25  ;;  %v66_v54 = vld [vmem:[%s3150_s26 + $0x40] sm:$0xff]  ;;  %v1863_v60 = vpack.c.bf16 %v75_v59, %v72_v58  ;;  %v81_v3 = vld [vmem:[%s3150_s26 + $0xb8] sm:$0xff]  ;;  %v427_v5 = vld [vmem:[%s3136_s7 + $0x8] sm:$0xff] }
  0x1a   :  { %1868 = vmatprep.subr.bf16.mxu0 %v2148_v8  ;;  %1858 = vmatpush3.bf16.msra.mxu1 %v1857_v55  ;;  %v1860_v57 = vpack.c.bf16 %v69_v56, %v66_v54  ;;  %v78_v2 = vld [vmem:[%s3150_s26 + $0xa0] sm:$0xff]  ;;  %v428_v6 = vld [vmem:[%s3136_s7 + $0x10] sm:$0xff]  ;;  %v674_v10 = vld [vmem:[%s3139_s10 + $0x8] sm:$0xff] }
  0x1b   :  { %1859 = vmatprep.subr.bf16.mxu1 %v2148_v8  ;;  %v1866_v4 = vpack.c.bf16 %v81_v3, %v78_v2  ;;  %v426_v9 = vld [vmem:[%s3136_s7] sm:$0xff]  ;;  %v676_v11 = vld [vmem:[%s3139_s10 + $0x18] sm:$0xff]  ;;  %v675_v15 = vld [vmem:[%s3139_s10 + $0x10] sm:$0xff] }
  0x1c   :  { %1555 = vmatmul.mubr.msk.f32.vlgmr.msra.gmra.mrb[0].mxu0 %vm99_vm1, %v2303_v28  ;;  %v1907_v12 = vpack.c.bf16 %v676_v11, %v674_v10  ;;  %v673_v14 = vld [vmem:[%s3139_s10] sm:$0xff]  ;;  %v580_v17 = vld [vmem:[%s3137_s8 + $0x8] sm:$0xff]  ;;  %v680_v20 = vld [vmem:[%s3139_s10 + $0x38] sm:$0xff] }
  0x1d   :  { %1870 = vmatpush3.bf16.msra.mxu0 %v1869_v29  ;;  %1755 = vmatprep.mubr.msk.f32.mxu0 %vm2149_vm0, %v2147_v7  ;;  %v579_v16 = vld [vmem:[%s3137_s8] sm:$0xff]  ;;  %v678_v19 = vld [vmem:[%s3139_s10 + $0x28] sm:$0xff]  ;;  %v1909_v22 = vpack.c.bf16 %v675_v15, %v673_v14  ;;  %v679_v27 = vld [vmem:[%s3139_s10 + $0x30] sm:$0xff] }
  0x1e   :  { %1871 = vmatprep.subr.bf16.mxu0 %v2148_v8  ;;  %1861 = vmatpush3.bf16.msra.mxu1 %v1860_v57  ;;  %v1884_v23 = vpack.c.bf16 %v580_v17, %v579_v16  ;;  %v677_v24 = vld [vmem:[%s3139_s10 + $0x20] sm:$0xff]  ;;  %v1911_v26 = vpack.c.bf16 %v680_v20, %v678_v19  ;;  %v582_v29 = vld [vmem:[%s3137_s8 + $0x18] sm:$0xff]  ;;  %v682_v30 = vld [vmem:[%s3139_s10 + $0x48] sm:$0xff] }
  0x1f   :  { %1862 = vmatprep.subr.bf16.mxu1 %v2148_v8  ;;  %v684_v31 = vld [vmem:[%s3139_s10 + $0x58] sm:$0xff]  ;;  %v681_v34 = vld [vmem:[%s3139_s10 + $0x40] sm:$0xff]  ;;  %v683_v36 = vld [vmem:[%s3139_s10 + $0x50] sm:$0xff] }
  0x20   :  { %v583_v37 = vld [vmem:[%s3137_s8 + $0x20] sm:$0xff]  ;;  %v686_v39 = vld [vmem:[%s3139_s10 + $0x68] sm:$0xff]  ;;  %v688_v40 = vld [vmem:[%s3139_s10 + $0x78] sm:$0xff] }
  0x21   :  { %1873 = vmatpush3.bf16.msra.mxu0 %v1872_v32  ;;  %v1913_v32 = vpack.c.bf16 %v679_v27, %v677_v24  ;;  %v689_v52 = vld [vmem:[%s3139_s10 + $0x80] sm:$0xff]  ;;  %v691_v54 = vld [vmem:[%s3139_s10 + $0x90] sm:$0xff]  ;;  %v588_v56 = vld [vmem:[%s3137_s8 + $0x48] sm:$0xff] }
  0x22   :  { %1874 = vmatprep.subr.bf16.mxu0 %v2148_v8  ;;  %1864 = vmatpush3.bf16.msra.mxu1 %v1863_v60  ;;  %v587_v55 = vld [vmem:[%s3137_s8 + $0x40] sm:$0xff]  ;;  %v694_v57 = vld [vmem:[%s3139_s10 + $0xa8] sm:$0xff]  ;;  %v696_v58 = vld [vmem:[%s3139_s10 + $0xb8] sm:$0xff]  ;;  %v1925_v59 = vpack.c.bf16 %v691_v54, %v689_v52 }
  0x23   :  { %1865 = vmatprep.subr.bf16.mxu1 %v2148_v8  ;;  %v1896_v60 = vpack.c.bf16 %v588_v56, %v587_v55  ;;  %v698_v2 = vld [vmem:[%s3139_s10 + $0xc8] sm:$0xff]  ;;  %v700_v3 = vld [vmem:[%s3139_s10 + $0xd8] sm:$0xff]  ;;  %v699_v10 = vld [vmem:[%s3139_s10 + $0xd0] sm:$0xff] }
  0x24   :  { %v591_v11 = vld [vmem:[%s3137_s8 + $0x60] sm:$0xff]  ;;  %v702_v15 = vld [vmem:[%s3139_s10 + $0xe8] sm:$0xff]  ;;  %v704_v16 = vld [vmem:[%s3139_s10 + $0xf8] sm:$0xff] }
  0x25   :  { %1876 = vmatpush3.bf16.msra.mxu0 %v1875_v35  ;;  %v1915_v35 = vpack.c.bf16 %v684_v31, %v682_v30  ;;  %v1935_v17 = vpack.c.bf16 %v704_v16, %v702_v15  ;;  %v703_v19 = vld [vmem:[%s3139_s10 + $0xf0] sm:$0xff]  ;;  %v706_v24 = vld [vmem:[%s3139_s10 + $0x108] sm:$0xf]  ;;  %v1586_v27 = vld [vmem:[%s3139_s10 + $0x118] sm:$0xff]  ;;  %v84_v30 = vlaneseq }
  0x26   :  { %1877 = vmatprep.subr.bf16.mxu0 %v2148_v8  ;;  %1867 = vmatpush3.bf16.msra.mxu1 %v1866_v4  ;;  %v1569_v56 = vld [vmem:[%s3137_s8 + $0x90] sm:$0xff] }
  0x27   :  { %1765 = vmatprep.subr.mxu1 %v2147_v7  ;;  %v85_v31 = vshrl.u32 %v84_v30, 7  ;;  %v1597_v16 = vld [vmem:[%s3139_s10 + $0x170] sm:$0xff] }
  0x29   :  { %1879 = vmatpush3.bf16.msra.mxu0 %v1878_v38  ;;  %1737 = vmatmul.mubr.msk.f32.vlgmr.msra.gmra.mrb[0].mxu1 %vm99_vm1, %v2303_v28  ;;  %v584_v38 = vld [vmem:[%s3137_s8 + $0x28] sm:$0xff] }
  0x2a   :  { %1880 = vmatprep.subr.bf16.mxu0 %v2148_v8  ;;  %1767 = vmatprep.mubr.msk.f32.mxu1 %vm2149_vm0, %v2147_v7 }
  0x2b   :  { %1766 = vmatpush3.msra.mxu1 %v428_v6  ;;  %v697_v6 = vld [vmem:[%s3139_s10 + $0xc0] sm:$0xff] }
  0x2c   :  { %1756 = vmatmul.mubr.msk.f32.vlgmr.msra.gmra.mrb[2].mxu0 %vm99_vm1, %v2303_v28  ;;  %1883 = vmatprep.subr.bf16.mxu1 %v2148_v8  ;;  %v581_v28 = vld [vmem:[%s3137_s8 + $0x10] sm:$0xff] }
  0x2d   :  { %1762 = vmatprep.mubr.msk.f32.mxu0 %vm2149_vm0, %v2147_v7  ;;  %1882 = vmatpush3.bf16.msra.mxu0 %v1881_v41  ;;  %v1887_v33 = vpack.c.bf16 %v582_v29, %v581_v28  ;;  %v1917_v41 = vpack.c.bf16 %v683_v36, %v681_v34  ;;  %v1588_v28 = vld [vmem:[%s3139_s10 + $0x128] sm:$0xff]  ;;  %v82_v34 = vld [vmem:[%s3131_s2] sm:$0x7] }
  0x2e   :  { %432 = vmatprep.subr.mxu0 %v427_v5  ;;  %v1963_v29 = vpack.c.bf16 %v1588_v28, %v1586_v27  ;;  %v1603_v27 = vld [vmem:[%s3139_s10 + $0x1a0] sm:$0xff]  ;;  %v1606_v28 = vld [vmem:[%s3139_s10 + $0x1b8] sm:$0xff] }
  0xff   :  { %v325_v43 = vpop.f32.mrb[2].mxu0 }
 0x100   :  { %v326_v44 = vadd.f32 %v1557_v42, %v325_v43  ;;  %v1757_v45 = vpop.f32.mrb[3].mxu0  ;;  %v1890_v42 = vpack.c.bf16 %v584_v38, %v583_v37  ;;  %v685_v43 = vld [vmem:[%s3139_s10 + $0x60] sm:$0xff] }
 0x101   :  { %v687_v45 = vld [vmem:[%s3139_s10 + $0x70] sm:$0xff] }
 0x102   :  { %v329_v46 = vmax.f32 %v326_v44, 0.0  ;;  %v1919_v44 = vpack.c.bf16 %v688_v40, %v686_v39  ;;  %v1567_v39 = vld [vmem:[%s3137_s8 + $0x80] sm:$0xff]  ;;  %v1568_v40 = vld [vmem:[%s3137_s8 + $0x88] sm:$0xff] }
 0x103   :  { %v1940_v52 = vpack.c.bf16 %v1568_v40, %v1567_v39  ;;  %v1610_v39 = vld [vmem:[%s3139_s10 + $0x1d8] sm:$0xff]  ;;  %v1612_v40 = vld [vmem:[%s3139_s10 + $0x1e8] sm:$0xff] }
 0x104   :  { %1763 = vmatmul.mubr.msk.f32.vlgmr.msra.gmra.mrb[4].mxu0 %vm339_vm2, %v329_v46  ;;  %v585_v46 = vld [vmem:[%s3137_s8 + $0x30] sm:$0xff] }
 0x105   :  { %496 = vmatprep.mubr.f32.mxu0 %v2147_v7  ;;  %433 = vmatpush1.msra.mxu0 %v426_v9  ;;  %v1931_v9 = vpack.c.bf16 %v700_v3, %v698_v2  ;;  %v1571_v2 = vld [vmem:[%s3137_s8 + $0xa0] sm:$0xff]  ;;  %v1572_v3 = vld [vmem:[%s3137_s8 + $0xa8] sm:$0xff] }
 0x106   :  { %1908 = vmatprep.subr.bf16.mxu0 %v1907_v12  ;;  %v592_v12 = vld [vmem:[%s3137_s8 + $0x68] sm:$0xff] }
 0x107   :  { %v1902_v14 = vpack.c.bf16 %v592_v12, %v591_v11  ;;  %v1946_v11 = vpack.c.bf16 %v1572_v3, %v1571_v2  ;;  %v1065_v2 = vld [vmem:[%s3142_s13 + $0x8] sm:$0xff]  ;;  %v1067_v3 = vld [vmem:[%s3142_s13 + $0x18] sm:$0xff] }
 0x1d7   :  { %v409_v48 = vpop.f32.mrb[4].mxu0 }
 0x1d8   :  { %v410_v49 = vadd.f32 %v1559_v47, %v409_v48  ;;  %v1764_v50 = vpop.f32.mrb[5].mxu0  ;;  %v586_v47 = vld [vmem:[%s3137_s8 + $0x38] sm:$0xff]  ;;  %v690_v48 = vld [vmem:[%s3139_s10 + $0x88] sm:$0xff] }
 0x1d9   :  { %v1921_v50 = vpack.c.bf16 %v687_v45, %v685_v43  ;;  %v1585_v43 = vld [vmem:[%s3139_s10 + $0x110] sm:$0xff] }
 0x1da   :  { %v414_v51 = vsel %vm413_vm3, %v410_v49, -inf }
 0x1db   :  { %415 = vmax.xlane.f32.xlu0 %v414_v51  ;;  %v1893_v51 = vpack.c.bf16 %v586_v47, %v585_v46 }
 0x268   :  { %v416_v61 = vpop.xlane.xlu0 %415 }
 0x269   :  { %v417_v62 = vsub.f32 %v410_v49, %v416_v61  ;;  %v692_v49 = vld [vmem:[%s3139_s10 + $0x98] sm:$0xff]  ;;  %v693_v61 = vld [vmem:[%s3139_s10 + $0xa0] sm:$0xff] }
 0x26a   :  { %v1923_v53 = vpack.c.bf16 %v692_v49, %v690_v48  ;;  %v1590_v49 = vld [vmem:[%s3139_s10 + $0x138] sm:$0xff] }
 0x26b   :  { %v418_v63 = vmul.f32 1.442695, %v417_v62 }
 0x26d   :  { %2113 = vpow2.f32 %v418_v63  ;;  %v695_v63 = vld [vmem:[%s3139_s10 + $0xb0] sm:$0xff] }
 0x26e   :  { %v1929_v4 = vpack.c.bf16 %v695_v63, %v693_v61  ;;  %v1591_v61 = vld [vmem:[%s3139_s10 + $0x140] sm:$0xff]  ;;  %v1596_v63 = vld [vmem:[%s3139_s10 + $0x168] sm:$0xff] }
 0x277   :  { %v2114_v0 = vpop.eup %2113 }
 0x278   :  { %v420_v1 = vsel %vm413_vm3, %v2114_v0, 0.0  ;;  %v589_v0 = vld [vmem:[%s3137_s8 + $0x50] sm:$0xff] }
 0x279   :  { %421 = vadd.xlane.f32.xlu0 %v420_v1  ;;  %v590_v1 = vld [vmem:[%s3137_s8 + $0x58] sm:$0xff] }
 0x27a   :  { %v1899_v5 = vpack.c.bf16 %v590_v1, %v589_v0 }
 0x306   :  { %v422_v13 = vpop.xlane.xlu0 %421 }
 0x307   :  { %2115 = vlog2.f32 %v422_v13  ;;  %v1933_v13 = vpack.c.bf16 %v699_v10, %v697_v6  ;;  %v1595_v6 = vld [vmem:[%s3139_s10 + $0x160] sm:$0xff]  ;;  %v1600_v10 = vld [vmem:[%s3139_s10 + $0x188] sm:$0xff] }
 0x311   :  { %v2116_v18 = vpop.eup %2115 }
 0x312   :  { %v424_v21 = vmul.f32 0.6931472, %v2116_v18  ;;  %v701_v18 = vld [vmem:[%s3139_s10 + $0xe0] sm:$0xff] }
 0x313   :  { %v1937_v20 = vpack.c.bf16 %v703_v19, %v701_v18  ;;  %v1602_v18 = vld [vmem:[%s3139_s10 + $0x198] sm:$0xff]  ;;  %v1604_v19 = vld [vmem:[%s3139_s10 + $0x1a8] sm:$0xff] }
 0x314   :  { %v2421_v25 = vsub.f32 %v417_v62, %v424_v21  ;;  %v1927_v62 = vpack.c.bf16 %v696_v58, %v694_v57  ;;  %v593_v21 = vld [vmem:[%s3137_s8 + $0x70] sm:$0xff]  ;;  %v1570_v57 = vld [vmem:[%s3137_s8 + $0x98] sm:$0xff] }
 0x315   :  { %v1943_v0 = vpack.c.bf16 %v1570_v57, %v1569_v56  ;;  %v1582_v56 = vld [vmem:[%s3137_s8 + $0xf8] sm:$0xff] }
 0x316   :  { %1561 = vmatmul.mubr.msk.f32.vlgmr.msra.gmra.mrb[0].mxu0 %vm413_vm3, %v2421_v25  ;;  %1768 = vmatmul.mubr.msk.f32.vlgmr.msra.gmra.mrb[0].mxu1 %vm413_vm3, %v2421_v25 }
 0x317   :  { %1910 = vmatpush1.bf16.msra.mxu0 %v1909_v22  ;;  %1885 = vmatpush3.bf16.msra.mxu1 %v1884_v23  ;;  %v594_v22 = vld [vmem:[%s3137_s8 + $0x78] sm:$0xff] }
 0x318   :  { %1912 = vmatprep.subr.bf16.mxu0 %v1911_v26  ;;  %1886 = vmatprep.subr.bf16.mxu1 %v2148_v8  ;;  %v1905_v23 = vpack.c.bf16 %v594_v22, %v593_v21  ;;  %v705_v26 = vld [vmem:[%s3139_s10 + $0x100] sm:$0xf] }
 0x319   :  { %1802 = vmatprep.mubr.msk.f32.mxu1 %vm2149_vm0, %v2147_v7  ;;  %v1575_v22 = vld [vmem:[%s3137_s8 + $0xc0] sm:$0xff] }
 0x31b   :  { %1914 = vmatpush1.bf16.msra.mxu0 %v1913_v32  ;;  %1888 = vmatpush3.bf16.msra.mxu1 %v1887_v33  ;;  %v2568_v32 = vsub.s32 0, %v85_v31  ;;  %v94_v33 = vsub.s32 2, %v85_v31 }
 0x31c   :  { %1916 = vmatprep.subr.bf16.mxu0 %v1915_v35  ;;  %1889 = vmatprep.subr.bf16.mxu1 %v2148_v8  ;;  %v2573_v35 = vsub.s32 1, %v85_v31 }
 0x31d   :  { %v87_v36 = vrot.slane %v82_v34, %v2568_v32  ;;  %v95_v37 = vrot.slane %v82_v34, %v94_v33  ;;  %v1577_v33 = vld [vmem:[%s3137_s8 + $0xd0] sm:$0xff] }
 0x31e   :  { %v91_v38 = vrot.slane %v82_v34, %v2573_v35  ;;  %v1578_v34 = vld [vmem:[%s3137_s8 + $0xd8] sm:$0xff] }
 0x31f   :  { %1918 = vmatpush1.bf16.msra.mxu0 %v1917_v41  ;;  %1891 = vmatpush3.bf16.msra.mxu1 %v1890_v42 }
 0x320   :  { %1920 = vmatprep.subr.bf16.mxu0 %v1919_v44  ;;  %1892 = vmatprep.subr.bf16.mxu1 %v2148_v8  ;;  %v1587_v44 = vld [vmem:[%s3139_s10 + $0x120] sm:$0xff] }
 0x321   :  { %v1965_v55 = vpack.c.bf16 %v1587_v44, %v1585_v43  ;;  %v1579_v43 = vld [vmem:[%s3137_s8 + $0xe0] sm:$0xff]  ;;  %v1580_v44 = vld [vmem:[%s3137_s8 + $0xe8] sm:$0xff] }
 0x323   :  { %1922 = vmatpush1.bf16.msra.mxu0 %v1921_v50  ;;  %1894 = vmatpush3.bf16.msra.mxu1 %v1893_v51  ;;  %v1592_v50 = vld [vmem:[%s3139_s10 + $0x148] sm:$0xff] }
 0x324   :  { %1924 = vmatprep.subr.bf16.mxu0 %v1923_v53  ;;  %1895 = vmatprep.subr.bf16.mxu1 %v2148_v8 }
 0x327   :  { %1926 = vmatpush1.bf16.msra.mxu0 %v1925_v59  ;;  %1897 = vmatpush3.bf16.msra.mxu1 %v1896_v60  ;;  %v1967_v59 = vpack.c.bf16 %v1592_v50, %v1590_v49  ;;  %v1589_v60 = vld [vmem:[%s3139_s10 + $0x130] sm:$0xff]  ;;  %v1611_v49 = vld [vmem:[%s3139_s10 + $0x1e0] sm:$0xff]  ;;  %v1958_v50 = vpack.c.bf16 %v1580_v44, %v1579_v43  ;;  %v1081_v44 = vld [vmem:[%s3142_s13 + $0x88] sm:$0xff] }
 0x328   :  { %1928 = vmatprep.subr.bf16.mxu0 %v1927_v62  ;;  %1898 = vmatprep.subr.bf16.mxu1 %v2148_v8  ;;  %v1594_v62 = vld [vmem:[%s3139_s10 + $0x158] sm:$0xff]  ;;  %v1969_v1 = vpack.c.bf16 %v1591_v61, %v1589_v60  ;;  %v1616_v60 = vld [vmem:[%s3139_s10 + $0x208] sm:$0xff]  ;;  %v1078_v43 = vld [vmem:[%s3142_s13 + $0x70] sm:$0xff] }
 0x32b   :  { %1930 = vmatpush1.bf16.msra.mxu0 %v1929_v4  ;;  %1900 = vmatpush3.bf16.msra.mxu1 %v1899_v5  ;;  %v1971_v4 = vpack.c.bf16 %v1596_v63, %v1594_v62  ;;  %v1593_v5 = vld [vmem:[%s3139_s10 + $0x150] sm:$0xff]  ;;  %v1615_v62 = vld [vmem:[%s3139_s10 + $0x200] sm:$0xff] }
 0x32c   :  { %1932 = vmatprep.subr.bf16.mxu0 %v1931_v9  ;;  %1901 = vmatprep.subr.bf16.mxu1 %v2148_v8  ;;  %v1598_v9 = vld [vmem:[%s3139_s10 + $0x178] sm:$0xff]  ;;  %v1973_v12 = vpack.c.bf16 %v1595_v6, %v1593_v5  ;;  %v707_v5 = vld [vmem:[%s3140_s11] sm:$0x3] }
 0x32d   :  { %v1975_v15 = vpack.c.bf16 %v1600_v10, %v1598_v9  ;;  %v1563_v6 = vld [vmem:[%s3138_s9] ss:$0 sm:$0xff]  ;;  %v712_v9 = vrot.slane %v707_v5, %v2568_v32  ;;  %v716_v10 = vrot.slane %v707_v5, %v2573_v35  ;;  %v1095_v5 = vld [vmem:[%s3142_s13 + $0xf8] sm:$0xff] }
 0x32f   :  { %1934 = vmatpush1.bf16.msra.mxu0 %v1933_v13  ;;  %1903 = vmatpush3.bf16.msra.mxu1 %v1902_v14  ;;  %v1573_v13 = vld [vmem:[%s3137_s8 + $0xb0] sm:$0xff]  ;;  %v1574_v14 = vld [vmem:[%s3137_s8 + $0xb8] sm:$0xff] }
 0x330   :  { %1904 = vmatprep.subr.bf16.mxu1 %v2148_v8  ;;  %1936 = vmatprep.subr.bf16.mxu0 %v1935_v17  ;;  %v1599_v17 = vld [vmem:[%s3139_s10 + $0x180] sm:$0xff] }
 0x331   :  { %v1977_v21 = vpack.c.bf16 %v1599_v17, %v1597_v16 }
 0x333   :  { %1938 = vmatpush1.bf16.msra.mxu0 %v1937_v20  ;;  %1906 = vmatpush3.bf16.msra.mxu1 %v1905_v23  ;;  %v1949_v20 = vpack.c.bf16 %v1574_v14, %v1573_v13  ;;  %v1576_v23 = vld [vmem:[%s3137_s8 + $0xc8] sm:$0xff] }
 0x334   :  { %1939 = vmatprep.subr.bf16.mxu1 %v2148_v8  ;;  %1564 = vmatprep.subr.msk.mxu0 %vm723_vm4, %v706_v24  ;;  %v1979_v24 = vpack.c.bf16 %v1604_v19, %v1602_v18  ;;  %v1952_v30 = vpack.c.bf16 %v1576_v23, %v1575_v22  ;;  %v1069_v14 = vld [vmem:[%s3142_s13 + $0x28] sm:$0xff] }
 0x337   :  { %1565 = vmatpush1.msk.msra.mxu0 %vm723_vm4, %v705_v26  ;;  %v1601_v26 = vld [vmem:[%s3139_s10 + $0x190] sm:$0xff] }
 0x338   :  { %1964 = vmatprep.subr.bf16.mxu0 %v1963_v29  ;;  %v1608_v29 = vld [vmem:[%s3139_s10 + $0x1c8] sm:$0xff]  ;;  %v1981_v31 = vpack.c.bf16 %v1603_v27, %v1601_v26  ;;  %v1068_v26 = vld [vmem:[%s3142_s13 + $0x20] sm:$0xff]  ;;  %v1070_v27 = vld [vmem:[%s3142_s13 + $0x30] sm:$0xff] }
 0x3e9   :  { %v498_v41 = vpop.f32.mrb[0].mxu0  ;;  %v569_v42 = vpop.f32.mrb[0].mxu1 }
 0x3ea   :  { %v2589_v45 = vadd.f32 %v498_v41, %v87_v36  ;;  %v2591_v46 = vadd.f32 %v569_v42, %v95_v37  ;;  %v500_v47 = vpop.f32.mrb[1].mxu0  ;;  %v1769_v48 = vpop.f32.mrb[1].mxu1  ;;  %v1983_v36 = vpack.c.bf16 %v1608_v29, %v1606_v28  ;;  %v1605_v37 = vld [vmem:[%s3139_s10 + $0x1b0] sm:$0xff]  ;;  %v1955_v41 = vpack.c.bf16 %v1578_v34, %v1577_v33  ;;  %v1073_v28 = vld [vmem:[%s3142_s13 + $0x48] sm:$0xff]  ;;  %v1075_v29 = vld [vmem:[%s3142_s13 + $0x58] sm:$0xff] }
 0x3eb   :  { %v2599_v51 = vadd.f32 %v500_v47, %v91_v38  ;;  %v1607_v38 = vld [vmem:[%s3139_s10 + $0x1c0] sm:$0xff]  ;;  %v1987_v47 = vpack.c.bf16 %v1612_v40, %v1610_v39  ;;  %v1609_v48 = vld [vmem:[%s3139_s10 + $0x1d0] sm:$0xff]  ;;  %v2001_v33 = vpack.c.bf16 %v1070_v27, %v1068_v26  ;;  %v2003_v34 = vpack.c.bf16 %v1075_v29, %v1073_v28  ;;  %v1079_v39 = vld [vmem:[%s3142_s13 + $0x78] sm:$0xff] }
 0x3ec   :  { %v576_v53 = vmax.f32 %v2589_v45, 0.0  ;;  %v578_v54 = vmax.f32 %v2591_v46, 0.0  ;;  %v1985_v42 = vpack.c.bf16 %v1607_v38, %v1605_v37  ;;  %v1074_v37 = vld [vmem:[%s3142_s13 + $0x50] sm:$0xff]  ;;  %v1077_v38 = vld [vmem:[%s3142_s13 + $0x68] sm:$0xff]  ;;  %v1032_v28 = vld [vmem:[%s3141_s12] sm:$0xff] }
 0x3ed   :  { %v577_v58 = vmax.f32 %v2599_v51, 0.0  ;;  %v1034_v29 = vld [vmem:[%s3141_s12 + $0x10] sm:$0xff]  ;;  %v1041_v46 = vld [vmem:[%s3141_s12 + $0x48] sm:$0xff]  ;;  %v1043_v51 = vld [vmem:[%s3141_s12 + $0x58] sm:$0xff] }
 0x3ee   :  { %1803 = vmatmul.mubr.f32.vlgmr.msra.gmra.mrb[2].mxu1 %v576_v53  ;;  %1566 = vmatprep.mubr.msk.f32.mxu0 %vm719_vm5, %v578_v54  ;;  %v1290_v45 = vld [vmem:[%s3144_s15 + $0x90] sm:$0xff] }
 0x3ef   :  { %795 = vmatmul.mubr.f32.vlgmr.msra.gmra.mrb[6].mxu0 %v577_v58  ;;  %1941 = vmatpush3.bf16.msra.mxu1 %v1940_v52  ;;  %v1989_v52 = vpack.c.bf16 %v1611_v49, %v1609_v48 }
 0x3f0   :  { %1966 = vmatpush1.bf16.msra.mxu0 %v1965_v55  ;;  %1942 = vmatprep.subr.bf16.mxu1 %v2148_v8  ;;  %v1581_v55 = vld [vmem:[%s3137_s8 + $0xf0] sm:$0xff] }
 0x3f1   :  { %1968 = vmatprep.subr.bf16.mxu0 %v1967_v59  ;;  %1837 = vmatprep.mubr.msk.f32.mxu1 %vm2149_vm0, %v2147_v7  ;;  %v1961_v57 = vpack.c.bf16 %v1582_v56, %v1581_v55  ;;  %v1614_v59 = vld [vmem:[%s3139_s10 + $0x1f8] sm:$0xff]  ;;  %v1085_v55 = vld [vmem:[%s3142_s13 + $0xa8] sm:$0xff] }
 0x3f2   :  { %v1991_v61 = vpack.c.bf16 %v1616_v60, %v1614_v59  ;;  %v1087_v56 = vld [vmem:[%s3142_s13 + $0xb8] sm:$0xff]  ;;  %v1084_v60 = vld [vmem:[%s3142_s13 + $0xa0] sm:$0xff] }
 0x3f3   :  { %1944 = vmatpush3.bf16.msra.mxu1 %v1943_v0  ;;  %v1618_v0 = vld [vmem:[%s3139_s10 + $0x218] sm:$0xf]  ;;  %v2015_v59 = vpack.c.bf16 %v1087_v56, %v1085_v55 }
 0x3f4   :  { %1970 = vmatpush1.bf16.msra.mxu0 %v1969_v1  ;;  %1945 = vmatprep.subr.bf16.mxu1 %v2148_v8  ;;  %v1617_v1 = vld [vmem:[%s3139_s10 + $0x210] sm:$0xf]  ;;  %v1051_v55 = vld [vmem:[%s3141_s12 + $0x98] sm:$0xff] }
 0x3f5   :  { %1972 = vmatprep.subr.bf16.mxu0 %v1971_v4  ;;  %v1995_v4 = vpack.c.bf16 %v1067_v3, %v1065_v2  ;;  %v1090_v2 = vld [vmem:[%s3142_s13 + $0xd0] sm:$0xff] }
 0x3f7   :  { %1947 = vmatpush3.bf16.msra.mxu1 %v1946_v11  ;;  %v1064_v11 = vld [vmem:[%s3142_s13] sm:$0xff] }
 0x3f8   :  { %1974 = vmatpush1.bf16.msra.mxu0 %v1973_v12  ;;  %1948 = vmatprep.subr.bf16.mxu1 %v2148_v8  ;;  %v1066_v12 = vld [vmem:[%s3142_s13 + $0x10] sm:$0xff] }
 0x3f9   :  { %1976 = vmatprep.subr.bf16.mxu0 %v1975_v15  ;;  %v1071_v15 = vld [vmem:[%s3142_s13 + $0x38] sm:$0xff] }
 0x3fb   :  { %1950 = vmatpush3.bf16.msra.mxu1 %v1949_v20 }
 0x3fc   :  { %1978 = vmatpush1.bf16.msra.mxu0 %v1977_v21  ;;  %1951 = vmatprep.subr.bf16.mxu1 %v2148_v8  ;;  %v1997_v21 = vpack.c.bf16 %v1066_v12, %v1064_v11  ;;  %v1097_v12 = vld [vmem:[%s3142_s13 + $0x108] sm:$0xf] }
 0x3fd   :  { %1980 = vmatprep.subr.bf16.mxu0 %v1979_v24  ;;  %v1999_v24 = vpack.c.bf16 %v1071_v15, %v1069_v14  ;;  %v1035_v14 = vld [vmem:[%s3141_s12 + $0x18] sm:$0xff]  ;;  %v1096_v15 = vld [vmem:[%s3142_s13 + $0x100] sm:$0xf] }
 0x3ff   :  { %1953 = vmatpush3.bf16.msra.mxu1 %v1952_v30 }
 0x400   :  { %1982 = vmatpush1.bf16.msra.mxu0 %v1981_v31  ;;  %1954 = vmatprep.subr.bf16.mxu1 %v2148_v8 }
 0x401   :  { %1984 = vmatprep.subr.bf16.mxu0 %v1983_v36  ;;  %v1072_v36 = vld [vmem:[%s3142_s13 + $0x40] sm:$0xff] }
 0x402   :  { %v2005_v40 = vpack.c.bf16 %v1074_v37, %v1072_v36  ;;  %v2029_v36 = vpack.c.bf16 %v1034_v29, %v1032_v28  ;;  %v1274_v29 = vld [vmem:[%s3144_s15 + $0x10] sm:$0xff] }
 0x403   :  { %1956 = vmatpush3.bf16.msra.mxu1 %v1955_v41  ;;  %v2007_v41 = vpack.c.bf16 %v1079_v39, %v1077_v38  ;;  %v1036_v39 = vld [vmem:[%s3141_s12 + $0x20] sm:$0xff] }
 0x404   :  { %1986 = vmatpush1.bf16.msra.mxu0 %v1985_v42  ;;  %1957 = vmatprep.subr.bf16.mxu1 %v2148_v8  ;;  %v1076_v42 = vld [vmem:[%s3142_s13 + $0x60] sm:$0xff] }
 0x405   :  { %1988 = vmatprep.subr.bf16.mxu0 %v1987_v47  ;;  %v1083_v47 = vld [vmem:[%s3142_s13 + $0x98] sm:$0xff]  ;;  %v2009_v48 = vpack.c.bf16 %v1078_v43, %v1076_v42  ;;  %v1042_v42 = vld [vmem:[%s3141_s12 + $0x50] sm:$0xff]  ;;  %v1045_v43 = vld [vmem:[%s3141_s12 + $0x68] sm:$0xff] }
 0x406   :  { %v2011_v49 = vpack.c.bf16 %v1083_v47, %v1081_v44  ;;  %v1047_v44 = vld [vmem:[%s3141_s12 + $0x78] sm:$0xff] }
 0x407   :  { %1959 = vmatpush3.bf16.msra.mxu1 %v1958_v50  ;;  %v1080_v50 = vld [vmem:[%s3142_s13 + $0x80] sm:$0xff] }
 0x408   :  { %1990 = vmatpush1.bf16.msra.mxu0 %v1989_v52  ;;  %1960 = vmatprep.subr.bf16.mxu1 %v2148_v8  ;;  %v1613_v8 = vld [vmem:[%s3139_s10 + $0x1f0] sm:$0xff] }
 0x409   :  { %v1993_v63 = vpack.c.bf16 %v1615_v62, %v1613_v8  ;;  %1992 = vmatprep.subr.bf16.mxu0 %v1991_v61  ;;  %v1082_v52 = vld [vmem:[%s3142_s13 + $0x90] sm:$0xff]  ;;  %v1089_v62 = vld [vmem:[%s3142_s13 + $0xc8] sm:$0xff] }
 0x40a   :  { %v1086_v8 = vld [vmem:[%s3142_s13 + $0xb0] sm:$0xff] }
 0x40b   :  { %1962 = vmatpush3.bf16.msra.mxu1 %v1961_v57  ;;  %v2013_v57 = vpack.c.bf16 %v1082_v52, %v1080_v50  ;;  %v2017_v61 = vpack.c.bf16 %v1086_v8, %v1084_v60  ;;  %v1046_v50 = vld [vmem:[%s3141_s12 + $0x70] sm:$0xff]  ;;  %v1049_v52 = vld [vmem:[%s3141_s12 + $0x88] sm:$0xff] }
 0x40c   :  { %1994 = vmatpush1.bf16.msra.mxu0 %v1993_v63  ;;  %1996 = vmatprep.subr.bf16.mxu1 %v1995_v4  ;;  %v1091_v63 = vld [vmem:[%s3142_s13 + $0xd8] sm:$0xff]  ;;  %v1093_v4 = vld [vmem:[%s3142_s13 + $0xe8] sm:$0xff]  ;;  %v1050_v60 = vld [vmem:[%s3141_s12 + $0x90] sm:$0xff] }
 0x40d   :  { %1620 = vmatprep.subr.msk.mxu0 %vm723_vm4, %v1618_v0  ;;  %v2019_v0 = vpack.c.bf16 %v1091_v63, %v1089_v62  ;;  %v1053_v8 = vld [vmem:[%s3141_s12 + $0xa8] sm:$0xff] }
 0x410   :  { %1621 = vmatpush1.msk.msra.mxu0 %vm723_vm4, %v1617_v1  ;;  %v1088_v1 = vld [vmem:[%s3142_s13 + $0xc0] sm:$0xff] }
 0x411   :  { %v2021_v3 = vpack.c.bf16 %v1090_v2, %v1088_v1  ;;  %v1054_v1 = vld [vmem:[%s3141_s12 + $0xb0] sm:$0xff]  ;;  %v1057_v2 = vld [vmem:[%s3141_s12 + $0xc8] sm:$0xff] }
 0x4c1   :  { %v668_v13 = vpop.f32.mrb[2].mxu1 }
 0x4c2   :  { %v669_v16 = vadd.f32 %v1563_v6, %v668_v13  ;;  %v1804_v17 = vpop.f32.mrb[3].mxu1  ;;  %v796_v18 = vpop.f32.mrb[6].mxu0  ;;  %v2023_v6 = vpack.c.bf16 %v1095_v5, %v1093_v4  ;;  %v1033_v13 = vld [vmem:[%s3141_s12 + $0x8] sm:$0xff] }
 0x4c3   :  { %v797_v19 = vadd.f32 %v796_v18, %v712_v9  ;;  %v798_v20 = vpop.f32.mrb[7].mxu0  ;;  %v1092_v9 = vld [vmem:[%s3142_s13 + $0xe0] sm:$0xff] }
 0x4c4   :  { %v672_v22 = vmax.f32 %v669_v16, 0.0  ;;  %v799_v23 = vadd.f32 %v798_v20, %v716_v10  ;;  %v1094_v10 = vld [vmem:[%s3142_s13 + $0xf0] sm:$0xff]  ;;  %v2027_v16 = vpack.c.bf16 %v1035_v14, %v1033_v13  ;;  %v1619_v17 = vld [vmem:[%s3140_s11 + $0x2] sm:$0x3] }
 0x4c5   :  { %v801_v31 = vmax.f32 %v797_v19, 0.0  ;;  %v2025_v11 = vpack.c.bf16 %v1094_v10, %v1092_v9  ;;  %v940_v19 = vrot.slane %v1619_v17, %v2568_v32  ;;  %v1058_v9 = vld [vmem:[%s3141_s12 + $0xd0] sm:$0xff]  ;;  %v1584_v10 = vld [vmem:[%s3138_s9 + $0x1] ss:$0 sm:$0xff]  ;;  %s2151_s9 = smov [#allocation2]  }
 0x4c6   :  { %v802_v30 = vmax.f32 %v799_v23, 0.0  ;;  %1838 = vmatmul.mubr.f32.vlgmr.msra.gmra.mrb[4].mxu1 %v672_v22 }
 0x4c7   :  { %1998 = vmatpush1.bf16.msra.mxu1 %v1997_v21  ;;  %v944_v21 = vrot.slane %v1619_v17, %v2573_v35  ;;  %v1062_v17 = vld [vmem:[%s3141_s12 + $0xf0] sm:$0xff] }
 0x4c8   :  { %1622 = vmatprep.mubr.msk.f32.mxu0 %vm719_vm5, %v802_v30  ;;  %2000 = vmatprep.subr.bf16.mxu1 %v1999_v24 }
 0x4c9   :  { %1021 = vmatmul.mubr.f32.vlgmr.msra.gmra.mrb[8].mxu0 %v801_v31  ;;  %v1037_v31 = vld [vmem:[%s3141_s12 + $0x28] sm:$0xff] }
 0x4cb   :  { %2002 = vmatpush1.bf16.msra.mxu1 %v2001_v33  ;;  %v1039_v33 = vld [vmem:[%s3141_s12 + $0x38] sm:$0xff] }
 0x4cc   :  { %2004 = vmatprep.subr.bf16.mxu1 %v2003_v34  ;;  %v2031_v38 = vpack.c.bf16 %v1039_v33, %v1037_v31  ;;  %v1292_v31 = vld [vmem:[%s3144_s15 + $0xa0] sm:$0xff]  ;;  %v1293_v33 = vld [vmem:[%s3144_s15 + $0xa8] sm:$0xff] }
 0x4cf   :  { %2006 = vmatpush1.bf16.msra.mxu1 %v2005_v40  ;;  %v1038_v40 = vld [vmem:[%s3141_s12 + $0x30] sm:$0xff] }
 0x4d0   :  { %2008 = vmatprep.subr.bf16.mxu1 %v2007_v41  ;;  %v1040_v41 = vld [vmem:[%s3141_s12 + $0x40] sm:$0xff] }
 0x4d1   :  { %v2037_v47 = vpack.c.bf16 %v1042_v42, %v1040_v41  ;;  %v1249_v42 = vld [vmem:[%s3143_s14] sm:$0x3] }
 0x4d3   :  { %2010 = vmatpush1.bf16.msra.mxu1 %v2009_v48  ;;  %v2039_v48 = vpack.c.bf16 %v1047_v44, %v1045_v43  ;;  %v1254_v43 = vrot.slane %v1249_v42, %v2568_v32  ;;  %v1258_v44 = vrot.slane %v1249_v42, %v2573_v35  ;;  %v1297_v32 = vld [vmem:[%s3144_s15 + $0xc8] sm:$0xff]  ;;  %v1280_v35 = vld [vmem:[%s3144_s15 + $0x40] sm:$0xff] }
 0x4d4   :  { %2012 = vmatprep.subr.bf16.mxu1 %v2011_v49  ;;  %v1044_v49 = vld [vmem:[%s3141_s12 + $0x60] sm:$0xff] }
 0x4d5   :  { %v2041_v56 = vpack.c.bf16 %v1046_v50, %v1044_v49 }
 0x4d7   :  { %2014 = vmatpush1.bf16.msra.mxu1 %v2013_v57  ;;  %v2043_v57 = vpack.c.bf16 %v1051_v55, %v1049_v52  ;;  %v1296_v55 = vld [vmem:[%s3144_s15 + $0xc0] sm:$0xff] }
 0x4d8   :  { %2016 = vmatprep.subr.bf16.mxu1 %v2015_v59  ;;  %v1048_v59 = vld [vmem:[%s3141_s12 + $0x80] sm:$0xff] }
 0x4d9   :  { %v2045_v62 = vpack.c.bf16 %v1050_v60, %v1048_v59  ;;  %v1298_v60 = vld [vmem:[%s3144_s15 + $0xd0] sm:$0xff] }
 0x4db   :  { %2018 = vmatpush1.bf16.msra.mxu1 %v2017_v61  ;;  %v1055_v61 = vld [vmem:[%s3141_s12 + $0xb8] sm:$0xff] }
 0x4dc   :  { %2020 = vmatprep.subr.bf16.mxu1 %v2019_v0  ;;  %v2047_v63 = vpack.c.bf16 %v1055_v61, %v1053_v8  ;;  %v1052_v0 = vld [vmem:[%s3141_s12 + $0xa0] sm:$0xff]  ;;  %v1299_v8 = vld [vmem:[%s3144_s15 + $0xd8] sm:$0xff] }
 0x4dd   :  { %v2049_v4 = vpack.c.bf16 %v1054_v1, %v1052_v0  ;;  %v2079_v61 = vpack.c.bf16 %v1299_v8, %v1298_v60  ;;  %v1300_v1 = vld [vmem:[%s3144_s15 + $0xe0] sm:$0xff] }
 0x4df   :  { %2022 = vmatpush1.bf16.msra.mxu1 %v2021_v3  ;;  %v1059_v3 = vld [vmem:[%s3141_s12 + $0xd8] sm:$0xff] }
 0x4e0   :  { %2024 = vmatprep.subr.bf16.mxu1 %v2023_v6  ;;  %v2051_v5 = vpack.c.bf16 %v1059_v3, %v1057_v2  ;;  %v1056_v6 = vld [vmem:[%s3141_s12 + $0xc0] sm:$0xff]  ;;  %v1301_v2 = vld [vmem:[%s3144_s15 + $0xe8] sm:$0xff] }
 0x4e1   :  { %v2053_v13 = vpack.c.bf16 %v1058_v9, %v1056_v6  ;;  %v1284_v3 = vld [vmem:[%s3144_s15 + $0x60] sm:$0xff]  ;;  %v1302_v6 = vld [vmem:[%s3144_s15 + $0xf0] sm:$0xff]  ;;  %v1303_v9 = vld [vmem:[%s3144_s15 + $0xf8] sm:$0xff] }
 0x4e3   :  { %2026 = vmatpush1.bf16.msra.mxu1 %v2025_v11  ;;  %v1061_v11 = vld [vmem:[%s3141_s12 + $0xe8] sm:$0xff] }
 0x4e4   :  { %1623 = vmatprep.subr.msk.mxu1 %vm723_vm4, %v1097_v12  ;;  %v1063_v12 = vld [vmem:[%s3141_s12 + $0xf8] sm:$0xff] }
 0x4e7   :  { %1624 = vmatpush1.msk.msra.mxu1 %vm723_vm4, %v1096_v15  ;;  %v2055_v15 = vpack.c.bf16 %v1063_v12, %v1061_v11  ;;  %v2087_v11 = vpack.c.bf16 %v1303_v9, %v1302_v6  ;;  %v1286_v12 = vld [vmem:[%s3144_s15 + $0x70] sm:$0xff] }
 0x4e8   :  { %2028 = vmatprep.subr.bf16.mxu1 %v2027_v16  ;;  %v1060_v16 = vld [vmem:[%s3141_s12 + $0xe0] sm:$0xff] }
 0x599   :  { %v2870_v18 = vpop.f32.mrb[4].mxu1 }
 0x59a   :  { %v1839_v20 = vpop.f32.mrb[5].mxu1  ;;  %v895_v14 = vadd.f32 %v1584_v10, %v2870_v18  ;;  %v1288_v18 = vld [vmem:[%s3144_s15 + $0x80] sm:$0xff] }
 0x59c   :  { %v1022_v22 = vpop.f32.mrb[8].mxu0  ;;  %v898_v20 = vmax.f32 %v895_v14, 0.0 }
 0x59d   :  { %v1023_v23 = vadd.f32 %v1022_v22, %v940_v19  ;;  %v1024_v24 = vpop.f32.mrb[9].mxu0  ;;  %v2057_v19 = vpack.c.bf16 %v1062_v17, %v1060_v16  ;;  %v1289_v22 = vld [vmem:[%s3144_s15 + $0x88] sm:$0xff] }
 0x59e   :  { %v1025_v26 = vadd.f32 %v1024_v24, %v944_v21  ;;  %v1029_v21 = vadd.f32 %v898_v20, %v576_v53  ;;  %v2059_v24 = vpack.c.bf16 %v1289_v22, %v1288_v18  ;;  %v1291_v53 = vld [vmem:[%s3144_s15 + $0x98] sm:$0xff]  ;;  %v1383_v22 = vld [vmem:[%s3145_s16 + $0x8] sm:$0xff] }
 0x59f   :  { %v1027_v27 = vmax.f32 %v1023_v23, 0.0  ;;  %v1272_v23 = vld [vmem:[%s3144_s15] sm:$0xff]  ;;  %v2063_v28 = vpack.c.bf16 %v1291_v53, %v1290_v45 }
 0x5a0   :  { %v1028_v30 = vmax.f32 %v1025_v26, 0.0  ;;  %v1273_v26 = vld [vmem:[%s3144_s15 + $0x8] sm:$0xff]  ;;  %2060 = vmatprep.subr.bf16.mxu0 %v2059_v24  ;;  %v1382_v24 = vld [vmem:[%s3145_s16] sm:$0xff] }
 0x5a1   :  { %v1030_v37 = vadd.f32 %v1027_v27, %v577_v58  ;;  %v2035_v58 = vpack.c.bf16 %v1043_v51, %v1041_v46  ;;  %v2061_v27 = vpack.c.bf16 %v1273_v26, %v1272_v23  ;;  %v1387_v23 = vld [vmem:[%s3145_s16 + $0x28] sm:$0xff]  ;;  %v1386_v45 = vld [vmem:[%s3145_s16 + $0x20] sm:$0xff] }
 0x5a2   :  { %v1031_v34 = vadd.f32 %v1028_v30, %v578_v54  ;;  %v2033_v54 = vpack.c.bf16 %v1038_v40, %v1036_v39  ;;  %v1275_v30 = vld [vmem:[%s3144_s15 + $0x18] sm:$0xff]  ;;  %v1294_v39 = vld [vmem:[%s3144_s15 + $0xb0] sm:$0xff]  ;;  %v2091_v26 = vpack.c.bf16 %v1387_v23, %v1383_v22  ;;  %v2093_v53 = vpack.c.bf16 %v1386_v45, %v1382_v24 }
 0x5a3   :  { %2062 = vmatpush3.bf16.msra.mxu0 %v2061_v27  ;;  %v1295_v40 = vld [vmem:[%s3144_s15 + $0xb8] sm:$0xff] }
 0x5a4   :  { %1625 = vmatprep.mubr.msk.f32.mxu1 %vm719_vm5, %v1031_v34  ;;  %v2065_v34 = vpack.c.bf16 %v1275_v30, %v1274_v29  ;;  %2064 = vmatprep.subr.bf16.mxu0 %v2063_v28  ;;  %v2071_v51 = vpack.c.bf16 %v1295_v40, %v1294_v39  ;;  %v1385_v30 = vld [vmem:[%s3145_s16 + $0x18] sm:$0xff]  ;;  %v1388_v39 = vld [vmem:[%s3145_s16 + $0x30] sm:$0xff] }
 0x5a5   :  { %1172 = vmatmul.mubr.f32.vlgmr.msra.gmra.mrb[6].mxu1 %v1030_v37  ;;  %v1276_v37 = vld [vmem:[%s3144_s15 + $0x20] sm:$0xff] }
 0x5a6   :  { %2030 = vmatpush1.bf16.msra.mxu1 %v2029_v36  ;;  %1242 = vmatprep.mubr.f32.mxu1 %v2147_v7  ;;  %v2067_v36 = vpack.c.bf16 %v1293_v33, %v1292_v31  ;;  %v1389_v31 = vld [vmem:[%s3145_s16 + $0x38] sm:$0xff] }
 0x5a7   :  { %2032 = vmatprep.subr.bf16.mxu1 %v2031_v38  ;;  %v1277_v38 = vld [vmem:[%s3144_s15 + $0x28] sm:$0xff]  ;;  %2066 = vmatpush3.bf16.msra.mxu0 %v2065_v34  ;;  %v2095_v33 = vpack.c.bf16 %v1389_v31, %v1385_v30 }
 0x5a8   :  { %v2069_v46 = vpack.c.bf16 %v1277_v38, %v1276_v37  ;;  %2068 = vmatprep.subr.bf16.mxu0 %v2067_v36  ;;  %v1384_v38 = vld [vmem:[%s3145_s16 + $0x10] sm:$0xff]  ;;  %s1547_s16 = sshll.u32 %s2151_s9, 4  ;;  %s1548_s16 = int_to_ptr.vmem [resolvable:$true] %s1547_s16 }
 0x5a9   :  { %v2097_v40 = vpack.c.bf16 %v1388_v39, %v1384_v38  ;;  %s2123_s3 = scalar_lea.vmem %s1548_s16, 256  ;;  %p2128_p1 = scmp.lt.s32.totalorder %s1548_s16, %s1548_s16 }
 0x5aa   :  { %2034 = vmatpush1.bf16.msra.mxu1 %v2033_v54  ;;  %v1278_v54 = vld [vmem:[%s3144_s15 + $0x30] sm:$0xff]  ;;  %p2124_p0 = scmp.ne.s32.totalorder %s1548_s16, %s2123_s3  ;;  %p2129_p2 = scmp.lt.s32.totalorder %s2123_s3, %s2123_s3 }
 0x5ab   :  { %2036 = vmatprep.subr.bf16.mxu1 %v2035_v58  ;;  %v1279_v58 = vld [vmem:[%s3144_s15 + $0x38] sm:$0xff]  ;;  %2070 = vmatpush3.bf16.msra.mxu0 %v2069_v46 }
 0x5ac   :  { %v2073_v41 = vpack.c.bf16 %v1279_v58, %v1278_v54  ;;  %2072 = vmatprep.subr.bf16.mxu0 %v2071_v51  ;;  %p2130_p3 = por %p2129_p2, %p2128_p1 }
 0x5ae   :  { %2038 = vmatpush1.bf16.msra.mxu1 %v2037_v47  ;;  %p2131_p4 = pnand %p2130_p3, %p2124_p0 }
 0x5af   :  { %2040 = vmatprep.subr.bf16.mxu1 %v2039_v48  ;;  %2074 = vmatpush3.bf16.msra.mxu0 %v2073_v41 }
 0x5b2   :  { %2042 = vmatpush1.bf16.msra.mxu1 %v2041_v56  ;;  %v2075_v56 = vpack.c.bf16 %v1297_v32, %v1296_v55 }
 0x5b3   :  { %2044 = vmatprep.subr.bf16.mxu1 %v2043_v57  ;;  %v1281_v57 = vld [vmem:[%s3144_s15 + $0x48] sm:$0xff] }
 0x5b4   :  { %v2077_v59 = vpack.c.bf16 %v1281_v57, %v1280_v35  ;;  %2076 = vmatprep.subr.bf16.mxu0 %v2075_v56 }
 0x5b6   :  { %2046 = vmatpush1.bf16.msra.mxu1 %v2045_v62  ;;  %2078 = vmatpush3.bf16.msra.mxu0 %v2077_v59  ;;  %v1282_v62 = vld [vmem:[%s3144_s15 + $0x50] sm:$0xff] }
 0x5b7   :  { %2048 = vmatprep.subr.bf16.mxu1 %v2047_v63  ;;  %v1283_v63 = vld [vmem:[%s3144_s15 + $0x58] sm:$0xff]  ;;  %2080 = vmatprep.subr.bf16.mxu0 %v2079_v61 }
 0x5b8   :  { %v2081_v0 = vpack.c.bf16 %v1283_v63, %v1282_v62 }
 0x5ba   :  { %2050 = vmatpush1.bf16.msra.mxu1 %v2049_v4  ;;  %2082 = vmatpush3.bf16.msra.mxu0 %v2081_v0  ;;  %v2083_v4 = vpack.c.bf16 %v1301_v2, %v1300_v1 }
 0x5bb   :  { %2052 = vmatprep.subr.bf16.mxu1 %v2051_v5  ;;  %v1285_v5 = vld [vmem:[%s3144_s15 + $0x68] sm:$0xff] }
 0x5bc   :  { %v2085_v10 = vpack.c.bf16 %v1285_v5, %v1284_v3  ;;  %2084 = vmatprep.subr.bf16.mxu0 %v2083_v4 }
 0x5be   :  { %2054 = vmatpush1.bf16.msra.mxu1 %v2053_v13  ;;  %v1287_v13 = vld [vmem:[%s3144_s15 + $0x78] sm:$0xff]  ;;  %2086 = vmatpush3.bf16.msra.mxu0 %v2085_v10 }
 0x5bf   :  { %2056 = vmatprep.subr.bf16.mxu1 %v2055_v15  ;;  %v2089_v14 = vpack.c.bf16 %v1287_v13, %v1286_v12  ;;  %2088 = vmatprep.subr.bf16.mxu0 %v2087_v11 }
 0x5c2   :  { %2058 = vmatpush1.bf16.msra.mxu1 %v2057_v19  ;;  %2090 = vmatpush3.bf16.msra.mxu0 %v2089_v14 }
 0x5c3   :  { %2092 = vmatprep.subr.bf16.mxu0 %v2091_v26 }
 0x5c5   :  { %1243 = vmatmul.mubr.f32.vlgmr.msra.gmra.mrb[6].mxu1 %v1029_v21 }
 0x698   :  { %v1244_v47 = vpop.f32.mrb[6].mxu1 }
 0x699   :  { %v3029_v48 = vadd.f32 %v1254_v43, %v1244_v47  ;;  %v1246_v49 = vpop.f32.mrb[7].mxu1 }
 0x69a   :  { %v3031_v50 = vadd.f32 %v1258_v44, %v1246_v49 }
 0x69c   :  { %v1263_v52 = vmax.f32 %v3029_v48, %v3031_v50 }
 0x69e   :  { %1264 = vmax.xlane.f32.xlu1 %v1263_v52 }
 0x72b   :  { %v1265_v15 = vpop.xlane.xlu1 %1264 }
 0x72c   :  { %v1266_v16 = vsub.f32 %v3029_v48, %v1265_v15  ;;  %v1267_v17 = vsub.f32 %v3031_v50, %v1265_v15 }
 0x72e   :  { %v1268_v19 = vmul.f32 1.442695, %v1266_v16  ;;  %v1270_v20 = vmul.f32 1.442695, %v1267_v17 }
 0x730   :  { %2117 = vpow2.f32 %v1268_v19 }
 0x731   :  { %2119 = vpow2.f32 %v1270_v20 }
 0x73a   :  { %v2118_v21 = vpop.eup %2117 }
 0x73b   :  { %v2120_v18 = vpop.eup %2119 }
 0x73c   :  { %1368 = vmatprep.mubr.f32.mxu0 %v2120_v18 }
 0x73d   :  { %1369 = vmatmul.mubr.f32.vlgmr.msra.gmra.mrb[10].mxu0 %v2118_v21 }
 0x73e   :  { %1457 = vmatprep.mubr.f32.mxu0 %v2147_v7  ;;  %2094 = vmatpush1.bf16.msra.mxu0 %v2093_v53 }
 0x73f   :  { %2096 = vmatprep.subr.bf16.mxu0 %v2095_v33 }
 0x810   :  { %v1717_v27 = vpop.f32.mrb[10].mxu0 }
 0x811   :  { %v1718_v28 = vpop.f32.mrb[11].mxu0 }
 0x812   :  { %v1719_v29 = vadd.f32 %v1718_v28, %v1717_v27 }
 0x814   :  { %2121 = vlog2.f32 %v1719_v29 }
 0x81e   :  { %v2122_v34 = vpop.eup %2121 }
 0x81f   :  { %v1375_v36 = vmul.f32 0.6931472, %v2122_v34 }
 0x821   :  { %v1376_v37 = vadd.f32 %v1375_v36, %v1265_v15 }
 0x823   :  { %1378 = vrot.lane.b32.xlu1 %v1376_v37, %s2150_s1 }
 0x895   :  { %v1379_v46 = vpop.permute.xlu1 %1378 }
 0x896   :  { %v1381_v51 = vsel %vm413_vm3, %v2421_v25, %v1379_v46 }
 0x897   :  { %1626 = vmatmul.mubr.msk.f32.vlgmr.msra.gmra.mrb[12].mxu0 %vm339_vm2, %v1381_v51 }
 0x898   :  { %2098 = vmatpush1.bf16.msra.mxu0 %v2097_v40  ;;  %1528 = vmatprep.mubr.f32.mxu0 %v2147_v7 }
 0x89b   :  { %1627 = vmatmul.mubr.msk.f32.vlgmr.msra.gmra.mrb[14].mxu0 %vm339_vm2, %v1381_v51 }
 0x96a   :  { %v1459_v54 = vpop.f32.mrb[12].mxu0 }
 0x96b   :  { %v1461_v58 = vpop.f32.mrb[13].mxu0 }
 0x96e   :  { %v1530_v41 = vpop.f32.mrb[14].mxu0 }
 0x96f   :  { %v1535_v42 = vsub.f32 %v3029_v48, %v1530_v41  ;;  %v1532_v43 = vpop.f32.mrb[15].mxu0 }
 0x970   :  { %v1536_v44 = vsub.f32 %v3031_v50, %v1532_v43 }
 0x971   :  { %v1537_v47 = vmul.f32 %v1535_v42, %v1459_v54 }
 0x972   :  { %v1538_v49 = vmul.f32 %v1536_v44, %v1461_v58 }
 0x973   :  { %1539 = vst [vmem:[#allocation2] sm:$0xff] %v1537_v47 }
 0x974   :  { %1540 = vst [vmem:[#allocation2 + $0x8] sm:$0xff] %v1538_v49 }
 0x975   :  { %2134 = shalt.err (!%p2131_p4)
}
 0x976   :  { %s2135_s24 = scalar_lea.hbm %s3146_s17, 256 }
 0x977   :  { %p2136_p5 = scmp.ne.s32.totalorder %s3146_s17, %s2135_s24  ;;  %p2139_p6 = scmp.lt.u32.totalorder %s2135_s24, %s3146_s17 }
 0x979   :  { %p2141_p7 = pnand %p2139_p6, %p2136_p5 }
 0x97b   :  { %2144 = shalt.err (!%p2141_p7)
}
 0x97c   :  { %1550 = dma.vmem_to_hbm [thread:$0]  %s1548_s16, 256, %s3146_s17, [#allocation3]  }
 0x97d   :  { %2145 = dma.done.wait [#allocation3], 256  }
 0x97e   :  { %2146 = vsyncadd [#allocation3], 4294967040 }
 0x97f   :  { %1554 = vsyncpa [#allocation3], 1 }

</bundles_post_ra>
